<compile_context>
chip_gen: v6e
topology: v6e:2x2x1
jax: 0.10.0
libtpu: 0.0.40
codegen_flags: <defaults>
</compile_context>

<pallas_src>
import functools
import math

import jax
import jax.numpy as jnp
from jax import lax
from jax.experimental import pallas as pl
from jax.experimental.pallas import tpu as pltpu

LN_EPS = 1e-5  # PyTorch nn.LayerNorm default


def _layernorm(x, w, b):
    mu = jnp.mean(x, axis=-1, keepdims=True)
    var = jnp.mean(jnp.square(x - mu), axis=-1, keepdims=True)
    return (x - mu) * lax.rsqrt(var + LN_EPS) * w + b


def transformer_block_kernel(n_heads, use_approx,
                             x_ref,
                             ln1_w, ln1_b,
                             w_qkv, b_qkv,
                             w_out, b_out,
                             ln2_w, ln2_b,
                             w_fc1, b_fc1,
                             w_fc2, b_fc2,
                             o_ref,
                             att_scratch):
    NB, L, d = x_ref.shape
    M = NB * L
    hd = d // n_heads
    scale = 1.0 / math.sqrt(hd)
    mm_dtype = w_qkv.dtype          # matmul operand dtype (bf16 fast path or f32)

    # Flattened row view: every position-wise matmul runs with M = NB*L rows.
    x = x_ref[...].astype(jnp.float32).reshape(M, d)

    # Read the small parameters once, at the top of the kernel.
    g1, be1 = ln1_w[...], ln1_b[...]
    g2, be2 = ln2_w[...], ln2_b[...]
    bq, bo = b_qkv[...], b_out[...]
    bf1, bf2 = b_fc1[...], b_fc2[...]

    # ---------------- attention branch: x + out_proj(MHA(LN1(x))) ----------------
    t = _layernorm(x, g1, be1)
    qkv = jnp.dot(t.astype(mm_dtype), w_qkv[...],
                  preferred_element_type=jnp.float32) + bq          # (M, 3d)
    q = (qkv[:, :d] * scale).reshape(NB, L, d)                      # fold 1/sqrt(hd) once
    k = qkv[:, d:2 * d].reshape(NB, L, d)
    v = qkv[:, 2 * d:].reshape(NB, L, d)

    # Static per-head loop; each head's output goes straight into VMEM scratch
    # (no lane-axis concatenate, bounded live values per head).
    # TODO(synk): for production L (>= 2k), tile this flash-style over KV blocks
    # (running max / running denominator) so the (L, L) score tile never
    # materializes; required to stay inside v7x's 64 MiB VMEM.
    for h in range(n_heads):
        sl = slice(h * hd, (h + 1) * hd)
        qh = q[:, :, sl].astype(mm_dtype)
        kh = k[:, :, sl].astype(mm_dtype)
        vh = v[:, :, sl].astype(mm_dtype)
        s = jnp.einsum('bqe,bke->bqk', qh, kh,
                       preferred_element_type=jnp.float32)          # (NB, L, L)
        s = s - jnp.max(s, axis=-1, keepdims=True)
        p = jnp.exp(s)
        den = jnp.sum(p, axis=-1, keepdims=True)
        if use_approx:
            p = p * pl.reciprocal(den, approx=True)                 # EUP slot, ~free
        else:
            p = p / den
        oh = jnp.einsum('bqk,bke->bqe', p.astype(mm_dtype), vh,
                        preferred_element_type=jnp.float32)         # (NB, L, hd)
        att_scratch[:, sl] = oh.reshape(M, hd)

    att = jnp.dot(att_scratch[...].astype(mm_dtype), w_out[...],
                  preferred_element_type=jnp.float32) + bo
    x = x + att

    # -------- position-wise MLP on LN2(x) (no residual, matching the module) --------
    t2 = _layernorm(x, g2, be2)
    h1 = jnp.dot(t2.astype(mm_dtype), w_fc1[...],
                 preferred_element_type=jnp.float32) + bf1
    sig_den = 1.0 + jnp.exp(-h1)                                    # SiLU = h * sigmoid(h)
    if use_approx:
        h1 = h1 * pl.reciprocal(sig_den, approx=True)
    else:
        h1 = h1 / sig_den
    out = jnp.dot(h1.astype(mm_dtype), w_fc2[...],
                  preferred_element_type=jnp.float32) + bf2
    o_ref[...] = out.reshape(NB, L, d).astype(o_ref.dtype)


def _pick_block_batch(n, seq_len, target_rows=512):
    """Largest divisor of n whose row count NB*L stays within target_rows."""
    best = 1
    for cand in range(1, n + 1):
        if n % cand == 0 and cand * seq_len <= target_rows:
            best = cand
    return best


def _vmem_limit_bytes(nb, seq_len, d, weight_bytes):
    m = nb * seq_len
    act = m * d * 4
    scores = nb * seq_len * seq_len * 4
    est = 2 * weight_bytes + 13 * act + 4 * scores
    est *= 2  # headroom for double-buffering / layout copies
    # Cap at 64 MiB so the request is legal on every generation (v7x physical VMEM).
    return int(max(16 * 1024 * 1024, min(est, 64 * 1024 * 1024)))


def transformer_block(x, params, n_heads, *, matmul_dtype=jnp.bfloat16,
                      block_batch=None, target_rows=512):
    """Fused TransformerBlock forward.  x: (N, L, d), batch-first."""
    N, L, d = x.shape
    assert d % n_heads == 0
    NB = block_batch if block_batch is not None else _pick_block_batch(N, L, target_rows)
    assert N % NB == 0, "block_batch must divide the batch size"

    f32 = jnp.float32
    mm = jnp.dtype(matmul_dtype)
    use_approx = (mm == jnp.dtype(jnp.bfloat16))

    def row(v):
        return jnp.asarray(v, f32).reshape(1, -1)

    # Pre-transposed weights, (in, out) layout, shipped in the matmul dtype.
    w_qkv_t = jnp.asarray(params['w_qkv'], f32).T.astype(mm)   # (d, 3d)
    w_out_t = jnp.asarray(params['w_out'], f32).T.astype(mm)   # (d, d)
    w_fc1_t = jnp.asarray(params['w_fc1'], f32).T.astype(mm)
    w_fc2_t = jnp.asarray(params['w_fc2'], f32).T.astype(mm)

    ins = [
        x,
        row(params['ln1_w']), row(params['ln1_b']),
        w_qkv_t, row(params['b_qkv']),
        w_out_t, row(params['b_out']),
        row(params['ln2_w']), row(params['ln2_b']),
        w_fc1_t, row(params['b_fc1']),
        w_fc2_t, row(params['b_fc2']),
    ]

    in_specs = ([pl.BlockSpec((NB, L, d), lambda b: (b, 0, 0))]
                + [pl.BlockSpec(a.shape, lambda b: (0, 0)) for a in ins[1:]])
    out_spec = pl.BlockSpec((NB, L, d), lambda b: (b, 0, 0))

    weight_bytes = sum(int(a.size) * a.dtype.itemsize for a in ins[1:])
    kernel = functools.partial(transformer_block_kernel, n_heads, use_approx)

    return pl.pallas_call(
        kernel,
        grid=(N // NB,),
        in_specs=in_specs,
        out_specs=out_spec,
        out_shape=jax.ShapeDtypeStruct((N, L, d), x.dtype),
        scratch_shapes=[pltpu.VMEM((NB * L, d), jnp.float32)],
        compiler_params=pltpu.CompilerParams(
            dimension_semantics=("parallel",),
            vmem_limit_bytes=_vmem_limit_bytes(NB, L, d, weight_bytes)),
    )(*ins)


def reference(x, params, n_heads):
    """Pure-JAX replica of the PyTorch forward (batch-first layout), for verification."""
    N, L, d = x.shape
    hd = d // n_heads

    def ln(v, w, b):
        mu = v.mean(-1, keepdims=True)
        var = ((v - mu) ** 2).mean(-1, keepdims=True)
        return (v - mu) / jnp.sqrt(var + LN_EPS) * w + b

    t = ln(x, params['ln1_w'], params['ln1_b'])
    qkv = t @ params['w_qkv'].T + params['b_qkv']          # (N, L, 3d)
    q, k, v = jnp.split(qkv, 3, axis=-1)

    def to_heads(a):
        return a.reshape(N, L, n_heads, hd).transpose(0, 2, 1, 3)   # (N,H,L,hd)

    qh, kh, vh = map(to_heads, (q, k, v))
    s = jnp.einsum('nhqe,nhke->nhqk', qh * (hd ** -0.5), kh)
    p = jax.nn.softmax(s, axis=-1)
    o = jnp.einsum('nhqk,nhke->nhqe', p, vh)
    o = o.transpose(0, 2, 1, 3).reshape(N, L, d)
    x = x + (o @ params['w_out'].T + params['b_out'])

    t2 = ln(x, params['ln2_w'], params['ln2_b'])
    h1 = t2 @ params['w_fc1'].T + params['b_fc1']
    h1 = h1 * jax.nn.sigmoid(h1)
    return h1 @ params['w_fc2'].T + params['b_fc2']


def init_params(key, d):
    ks = jax.random.split(key, 8)
    s = 0.05
    return {
        'ln1_w': jnp.ones((d,), jnp.float32) + 0.01 * jax.random.normal(ks[0], (d,)),
        'ln1_b': 0.01 * jax.random.normal(ks[1], (d,)),
        'w_qkv': s * jax.random.normal(ks[2], (3 * d, d)),   # packed in_proj_weight
        'b_qkv': s * jax.random.normal(ks[3], (3 * d,)),
        'w_out': s * jax.random.normal(ks[4], (d, d)),       # out_proj
        'b_out': s * jax.random.normal(ks[5], (d,)),
        'ln2_w': jnp.ones((d,), jnp.float32),
        'ln2_b': jnp.zeros((d,), jnp.float32),
        'w_fc1': s * jax.random.normal(ks[6], (d, d)),
        'b_fc1': jnp.zeros((d,), jnp.float32),
        'w_fc2': s * jax.random.normal(ks[7], (d, d)),
        'b_fc2': jnp.zeros((d,), jnp.float32),
    }


if __name__ == "__main__":
    key = jax.random.PRNGKey(0)
    kx, kp = jax.random.split(key)

    N, L, d, n_heads = 4, 8, 32, 8                  # batch, seq, embed, heads
    x = jax.random.normal(kx, (N, L, d), jnp.float32)
    params = init_params(kp, d)

    ref = reference(x, params, n_heads)

    # Exact path: f32 MXU operands + exact reciprocal; forced 2-step parallel grid.
    out_f32 = transformer_block(x, params, n_heads,
                                matmul_dtype=jnp.float32, block_batch=2)
    out_f32 = jax.block_until_ready(out_f32)
    assert out_f32.shape == (N, L, d)
    assert jnp.allclose(out_f32, ref, rtol=1e-4, atol=1e-4), "f32 kernel mismatch"

    # Fast path: bf16 MXU operands (f32 accumulation) + EUP approx reciprocals.
    out_bf16 = transformer_block(x, params, n_heads, matmul_dtype=jnp.bfloat16)
    out_bf16 = jax.block_until_ready(out_bf16)
    assert out_bf16.shape == (N, L, d)
    assert jnp.allclose(out_bf16, ref, rtol=2e-2, atol=2e-2), "bf16 kernel mismatch"

    print("KERNEL_OK")
</pallas_src>

<mosaic_0001>
module attributes {stable_mosaic.version = 11 : i64} {
  func.func @transformer_block_kernel(%arg0: i32, %arg1: memref<2x8x32xf32, #tpu.memory_space<vmem>>, %arg2: memref<1x32xf32, #tpu.memory_space<vmem>>, %arg3: memref<1x32xf32, #tpu.memory_space<vmem>>, %arg4: memref<32x96xf32, #tpu.memory_space<vmem>>, %arg5: memref<1x96xf32, #tpu.memory_space<vmem>>, %arg6: memref<32x32xf32, #tpu.memory_space<vmem>>, %arg7: memref<1x32xf32, #tpu.memory_space<vmem>>, %arg8: memref<1x32xf32, #tpu.memory_space<vmem>>, %arg9: memref<1x32xf32, #tpu.memory_space<vmem>>, %arg10: memref<32x32xf32, #tpu.memory_space<vmem>>, %arg11: memref<1x32xf32, #tpu.memory_space<vmem>>, %arg12: memref<32x32xf32, #tpu.memory_space<vmem>>, %arg13: memref<1x32xf32, #tpu.memory_space<vmem>>, %arg14: memref<2x8x32xf32, #tpu.memory_space<vmem>>, %arg15: memref<16x32xf32, #tpu.memory_space<vmem>>) attributes {dimension_semantics = [#tpu.dimension_semantics<parallel>], iteration_bounds = array<i64: 2>, scalar_prefetch = 0 : i64, scratch_operands = 1 : i64, tpu.core_type = #tpu.core_type<tc>, window_params = [{transform_indices = @transform_0, window_bounds = array<i64: 2, 8, 32>}, {pipeline_mode = #tpu.pipeline_mode<synchronous>, transform_indices = @transform_1, window_bounds = array<i64: 1, 32>}, {pipeline_mode = #tpu.pipeline_mode<synchronous>, transform_indices = @transform_2, window_bounds = array<i64: 1, 32>}, {pipeline_mode = #tpu.pipeline_mode<synchronous>, transform_indices = @transform_3, window_bounds = array<i64: 32, 96>}, {pipeline_mode = #tpu.pipeline_mode<synchronous>, transform_indices = @transform_4, window_bounds = array<i64: 1, 96>}, {pipeline_mode = #tpu.pipeline_mode<synchronous>, transform_indices = @transform_5, window_bounds = array<i64: 32, 32>}, {pipeline_mode = #tpu.pipeline_mode<synchronous>, transform_indices = @transform_6, window_bounds = array<i64: 1, 32>}, {pipeline_mode = #tpu.pipeline_mode<synchronous>, transform_indices = @transform_7, window_bounds = array<i64: 1, 32>}, {pipeline_mode = #tpu.pipeline_mode<synchronous>, transform_indices = @transform_8, window_bounds = array<i64: 1, 32>}, {pipeline_mode = #tpu.pipeline_mode<synchronous>, transform_indices = @transform_9, window_bounds = array<i64: 32, 32>}, {pipeline_mode = #tpu.pipeline_mode<synchronous>, transform_indices = @transform_10, window_bounds = array<i64: 1, 32>}, {pipeline_mode = #tpu.pipeline_mode<synchronous>, transform_indices = @transform_11, window_bounds = array<i64: 32, 32>}, {pipeline_mode = #tpu.pipeline_mode<synchronous>, transform_indices = @transform_12, window_bounds = array<i64: 1, 32>}, {transform_indices = @transform_13, window_bounds = array<i64: 2, 8, 32>}]} {
    %c0 = arith.constant 0 : index
    %c0_0 = arith.constant 0 : index
    %c0_1 = arith.constant 0 : index
    %0 = vector.load %arg1[%c0, %c0_0, %c0_1] : memref<2x8x32xf32, #tpu.memory_space<vmem>>, vector<2x8x32xf32>
    %1 = vector.shape_cast %0 : vector<2x8x32xf32> to vector<16x32xf32>
    %c0_2 = arith.constant 0 : index
    %c0_3 = arith.constant 0 : index
    %2 = vector.load %arg2[%c0_2, %c0_3] : memref<1x32xf32, #tpu.memory_space<vmem>>, vector<1x32xf32>
    %c0_4 = arith.constant 0 : index
    %c0_5 = arith.constant 0 : index
    %3 = vector.load %arg3[%c0_4, %c0_5] : memref<1x32xf32, #tpu.memory_space<vmem>>, vector<1x32xf32>
    %c0_6 = arith.constant 0 : index
    %c0_7 = arith.constant 0 : index
    %4 = vector.load %arg8[%c0_6, %c0_7] : memref<1x32xf32, #tpu.memory_space<vmem>>, vector<1x32xf32>
    %c0_8 = arith.constant 0 : index
    %c0_9 = arith.constant 0 : index
    %5 = vector.load %arg9[%c0_8, %c0_9] : memref<1x32xf32, #tpu.memory_space<vmem>>, vector<1x32xf32>
    %c0_10 = arith.constant 0 : index
    %c0_11 = arith.constant 0 : index
    %6 = vector.load %arg5[%c0_10, %c0_11] : memref<1x96xf32, #tpu.memory_space<vmem>>, vector<1x96xf32>
    %c0_12 = arith.constant 0 : index
    %c0_13 = arith.constant 0 : index
    %7 = vector.load %arg7[%c0_12, %c0_13] : memref<1x32xf32, #tpu.memory_space<vmem>>, vector<1x32xf32>
    %c0_14 = arith.constant 0 : index
    %c0_15 = arith.constant 0 : index
    %8 = vector.load %arg11[%c0_14, %c0_15] : memref<1x32xf32, #tpu.memory_space<vmem>>, vector<1x32xf32>
    %c0_16 = arith.constant 0 : index
    %c0_17 = arith.constant 0 : index
    %9 = vector.load %arg13[%c0_16, %c0_17] : memref<1x32xf32, #tpu.memory_space<vmem>>, vector<1x32xf32>
    %cst = arith.constant dense<0.000000e+00> : vector<16xf32>
    %10 = vector.multi_reduction <add>, %1, %cst [1] : vector<16x32xf32> to vector<16xf32>
    %11 = vector.shape_cast %10 : vector<16xf32> to vector<16x1xf32>
    %cst_18 = arith.constant 3.200000e+01 : f32
    %12 = vector.broadcast %cst_18 : f32 to vector<16x1xf32>
    %13 = arith.divf %11, %12 : vector<16x1xf32>
    %14 = vector.broadcast %13 : vector<16x1xf32> to vector<16x32xf32>
    %15 = arith.subf %1, %14 : vector<16x32xf32>
    %16 = arith.mulf %15, %15 : vector<16x32xf32>
    %cst_19 = arith.constant dense<0.000000e+00> : vector<16xf32>
    %17 = vector.multi_reduction <add>, %16, %cst_19 [1] : vector<16x32xf32> to vector<16xf32>
    %18 = vector.shape_cast %17 : vector<16xf32> to vector<16x1xf32>
    %cst_20 = arith.constant 3.200000e+01 : f32
    %19 = vector.broadcast %cst_20 : f32 to vector<16x1xf32>
    %20 = arith.divf %18, %19 : vector<16x1xf32>
    %21 = vector.broadcast %13 : vector<16x1xf32> to vector<16x32xf32>
    %22 = arith.subf %1, %21 : vector<16x32xf32>
    %cst_21 = arith.constant 9.99999974E-6 : f32
    %23 = vector.broadcast %cst_21 : f32 to vector<16x1xf32>
    %24 = arith.addf %20, %23 : vector<16x1xf32>
    %25 = math.rsqrt %24 : vector<16x1xf32>
    %26 = vector.broadcast %25 : vector<16x1xf32> to vector<16x32xf32>
    %27 = arith.mulf %22, %26 : vector<16x32xf32>
    %28 = vector.broadcast %2 : vector<1x32xf32> to vector<16x32xf32>
    %29 = arith.mulf %27, %28 : vector<16x32xf32>
    %30 = vector.broadcast %3 : vector<1x32xf32> to vector<16x32xf32>
    %31 = arith.addf %29, %30 : vector<16x32xf32>
    %c0_22 = arith.constant 0 : index
    %c0_23 = arith.constant 0 : index
    %32 = vector.load %arg4[%c0_22, %c0_23] : memref<32x96xf32, #tpu.memory_space<vmem>>, vector<32x96xf32>
    %cst_24 = arith.constant dense<0.000000e+00> : vector<16x96xf32>
    %33 = tpu.matmul %31, %32, %cst_24 {dimension_numbers = #tpu.dot_dimension_numbers<[1], [0], [0], [1], [0, 0, 1, 1], [], []>} : vector<16x32xf32>, vector<32x96xf32>, vector<16x96xf32> -> vector<16x96xf32>
    %34 = vector.broadcast %6 : vector<1x96xf32> to vector<16x96xf32>
    %35 = arith.addf %33, %34 : vector<16x96xf32>
    %36 = vector.extract_strided_slice %35 {offsets = [0, 0], sizes = [16, 32], strides = [1, 1]} : vector<16x96xf32> to vector<16x32xf32>
    %cst_25 = arith.constant 5.000000e-01 : f32
    %37 = vector.broadcast %cst_25 : f32 to vector<16x32xf32>
    %38 = arith.mulf %36, %37 : vector<16x32xf32>
    %39 = vector.shape_cast %38 : vector<16x32xf32> to vector<2x8x32xf32>
    %40 = vector.extract_strided_slice %35 {offsets = [0, 32], sizes = [16, 32], strides = [1, 1]} : vector<16x96xf32> to vector<16x32xf32>
    %41 = vector.shape_cast %40 : vector<16x32xf32> to vector<2x8x32xf32>
    %42 = vector.extract_strided_slice %35 {offsets = [0, 64], sizes = [16, 32], strides = [1, 1]} : vector<16x96xf32> to vector<16x32xf32>
    %43 = vector.shape_cast %42 : vector<16x32xf32> to vector<2x8x32xf32>
    %44 = vector.extract_strided_slice %39 {offsets = [0, 0, 0], sizes = [2, 8, 4], strides = [1, 1, 1]} : vector<2x8x32xf32> to vector<2x8x4xf32>
    %45 = vector.extract_strided_slice %41 {offsets = [0, 0, 0], sizes = [2, 8, 4], strides = [1, 1, 1]} : vector<2x8x32xf32> to vector<2x8x4xf32>
    %46 = vector.extract_strided_slice %43 {offsets = [0, 0, 0], sizes = [2, 8, 4], strides = [1, 1, 1]} : vector<2x8x32xf32> to vector<2x8x4xf32>
    "tpu.trace_start"() <{level = 10 : i32, message = "bqe,bke->bqk"}> : () -> ()
    %cst_26 = arith.constant dense<0.000000e+00> : vector<2x8x8xf32>
    %47 = tpu.matmul %44, %45, %cst_26 {dimension_numbers = #tpu.dot_dimension_numbers<[2], [2], [1], [1], [0, 0, 0, 1, 1, 1], [0], [0]>} : vector<2x8x4xf32>, vector<2x8x4xf32>, vector<2x8x8xf32> -> vector<2x8x8xf32>
    "tpu.trace_stop"() : () -> ()
    %cst_27 = arith.constant dense<0xFF800000> : vector<2x8xf32>
    %48 = vector.multi_reduction <maximumf>, %47, %cst_27 [2] : vector<2x8x8xf32> to vector<2x8xf32>
    %49 = vector.shape_cast %48 : vector<2x8xf32> to vector<2x8x1xf32>
    %50 = vector.broadcast %49 : vector<2x8x1xf32> to vector<2x8x8xf32>
    %51 = arith.subf %47, %50 : vector<2x8x8xf32>
    %52 = math.exp %51 : vector<2x8x8xf32>
    %cst_28 = arith.constant dense<0.000000e+00> : vector<2x8xf32>
    %53 = vector.multi_reduction <add>, %52, %cst_28 [2] : vector<2x8x8xf32> to vector<2x8xf32>
    %54 = vector.shape_cast %53 : vector<2x8xf32> to vector<2x8x1xf32>
    %55 = vector.broadcast %54 : vector<2x8x1xf32> to vector<2x8x8xf32>
    %56 = arith.divf %52, %55 : vector<2x8x8xf32>
    "tpu.trace_start"() <{level = 10 : i32, message = "bqk,bke->bqe"}> : () -> ()
    %cst_29 = arith.constant dense<0.000000e+00> : vector<2x8x4xf32>
    %57 = tpu.matmul %56, %46, %cst_29 {dimension_numbers = #tpu.dot_dimension_numbers<[2], [1], [1], [2], [0, 0, 0, 1, 1, 2], [0], [0]>} : vector<2x8x8xf32>, vector<2x8x4xf32>, vector<2x8x4xf32> -> vector<2x8x4xf32>
    "tpu.trace_stop"() : () -> ()
    %58 = vector.shape_cast %57 : vector<2x8x4xf32> to vector<16x4xf32>
    %c0_30 = arith.constant 0 : index
    %c0_31 = arith.constant 0 : index
    %59 = vector.load %arg15[%c0_30, %c0_31] : memref<16x32xf32, #tpu.memory_space<vmem>>, vector<16x4xf32>
    tpu.vector_store %arg15[%c0_30, %c0_31], %58 {strides = array<i32>} : memref<16x32xf32, #tpu.memory_space<vmem>>, vector<16x4xf32>,
    %60 = vector.extract_strided_slice %39 {offsets = [0, 0, 4], sizes = [2, 8, 4], strides = [1, 1, 1]} : vector<2x8x32xf32> to vector<2x8x4xf32>
    %61 = vector.extract_strided_slice %41 {offsets = [0, 0, 4], sizes = [2, 8, 4], strides = [1, 1, 1]} : vector<2x8x32xf32> to vector<2x8x4xf32>
    %62 = vector.extract_strided_slice %43 {offsets = [0, 0, 4], sizes = [2, 8, 4], strides = [1, 1, 1]} : vector<2x8x32xf32> to vector<2x8x4xf32>
    "tpu.trace_start"() <{level = 10 : i32, message = "bqe,bke->bqk"}> : () -> ()
    %cst_32 = arith.constant dense<0.000000e+00> : vector<2x8x8xf32>
    %63 = tpu.matmul %60, %61, %cst_32 {dimension_numbers = #tpu.dot_dimension_numbers<[2], [2], [1], [1], [0, 0, 0, 1, 1, 1], [0], [0]>} : vector<2x8x4xf32>, vector<2x8x4xf32>, vector<2x8x8xf32> -> vector<2x8x8xf32>
    "tpu.trace_stop"() : () -> ()
    %cst_33 = arith.constant dense<0xFF800000> : vector<2x8xf32>
    %64 = vector.multi_reduction <maximumf>, %63, %cst_33 [2] : vector<2x8x8xf32> to vector<2x8xf32>
    %65 = vector.shape_cast %64 : vector<2x8xf32> to vector<2x8x1xf32>
    %66 = vector.broadcast %65 : vector<2x8x1xf32> to vector<2x8x8xf32>
    %67 = arith.subf %63, %66 : vector<2x8x8xf32>
    %68 = math.exp %67 : vector<2x8x8xf32>
    %cst_34 = arith.constant dense<0.000000e+00> : vector<2x8xf32>
    %69 = vector.multi_reduction <add>, %68, %cst_34 [2] : vector<2x8x8xf32> to vector<2x8xf32>
    %70 = vector.shape_cast %69 : vector<2x8xf32> to vector<2x8x1xf32>
    %71 = vector.broadcast %70 : vector<2x8x1xf32> to vector<2x8x8xf32>
    %72 = arith.divf %68, %71 : vector<2x8x8xf32>
    "tpu.trace_start"() <{level = 10 : i32, message = "bqk,bke->bqe"}> : () -> ()
    %cst_35 = arith.constant dense<0.000000e+00> : vector<2x8x4xf32>
    %73 = tpu.matmul %72, %62, %cst_35 {dimension_numbers = #tpu.dot_dimension_numbers<[2], [1], [1], [2], [0, 0, 0, 1, 1, 2], [0], [0]>} : vector<2x8x8xf32>, vector<2x8x4xf32>, vector<2x8x4xf32> -> vector<2x8x4xf32>
    "tpu.trace_stop"() : () -> ()
    %74 = vector.shape_cast %73 : vector<2x8x4xf32> to vector<16x4xf32>
    %c0_36 = arith.constant 0 : index
    %c4 = arith.constant 4 : index
    %75 = vector.load %arg15[%c0_36, %c4] : memref<16x32xf32, #tpu.memory_space<vmem>>, vector<16x4xf32>
    tpu.vector_store %arg15[%c0_36, %c4], %74 {strides = array<i32>} : memref<16x32xf32, #tpu.memory_space<vmem>>, vector<16x4xf32>,
    %76 = vector.extract_strided_slice %39 {offsets = [0, 0, 8], sizes = [2, 8, 4], strides = [1, 1, 1]} : vector<2x8x32xf32> to vector<2x8x4xf32>
    %77 = vector.extract_strided_slice %41 {offsets = [0, 0, 8], sizes = [2, 8, 4], strides = [1, 1, 1]} : vector<2x8x32xf32> to vector<2x8x4xf32>
    %78 = vector.extract_strided_slice %43 {offsets = [0, 0, 8], sizes = [2, 8, 4], strides = [1, 1, 1]} : vector<2x8x32xf32> to vector<2x8x4xf32>
    "tpu.trace_start"() <{level = 10 : i32, message = "bqe,bke->bqk"}> : () -> ()
    %cst_37 = arith.constant dense<0.000000e+00> : vector<2x8x8xf32>
    %79 = tpu.matmul %76, %77, %cst_37 {dimension_numbers = #tpu.dot_dimension_numbers<[2], [2], [1], [1], [0, 0, 0, 1, 1, 1], [0], [0]>} : vector<2x8x4xf32>, vector<2x8x4xf32>, vector<2x8x8xf32> -> vector<2x8x8xf32>
    "tpu.trace_stop"() : () -> ()
    %cst_38 = arith.constant dense<0xFF800000> : vector<2x8xf32>
    %80 = vector.multi_reduction <maximumf>, %79, %cst_38 [2] : vector<2x8x8xf32> to vector<2x8xf32>
    %81 = vector.shape_cast %80 : vector<2x8xf32> to vector<2x8x1xf32>
    %82 = vector.broadcast %81 : vector<2x8x1xf32> to vector<2x8x8xf32>
    %83 = arith.subf %79, %82 : vector<2x8x8xf32>
    %84 = math.exp %83 : vector<2x8x8xf32>
    %cst_39 = arith.constant dense<0.000000e+00> : vector<2x8xf32>
    %85 = vector.multi_reduction <add>, %84, %cst_39 [2] : vector<2x8x8xf32> to vector<2x8xf32>
    %86 = vector.shape_cast %85 : vector<2x8xf32> to vector<2x8x1xf32>
    %87 = vector.broadcast %86 : vector<2x8x1xf32> to vector<2x8x8xf32>
    %88 = arith.divf %84, %87 : vector<2x8x8xf32>
    "tpu.trace_start"() <{level = 10 : i32, message = "bqk,bke->bqe"}> : () -> ()
    %cst_40 = arith.constant dense<0.000000e+00> : vector<2x8x4xf32>
    %89 = tpu.matmul %88, %78, %cst_40 {dimension_numbers = #tpu.dot_dimension_numbers<[2], [1], [1], [2], [0, 0, 0, 1, 1, 2], [0], [0]>} : vector<2x8x8xf32>, vector<2x8x4xf32>, vector<2x8x4xf32> -> vector<2x8x4xf32>
    "tpu.trace_stop"() : () -> ()
    %90 = vector.shape_cast %89 : vector<2x8x4xf32> to vector<16x4xf32>
    %c0_41 = arith.constant 0 : index
    %c8 = arith.constant 8 : index
    %91 = vector.load %arg15[%c0_41, %c8] : memref<16x32xf32, #tpu.memory_space<vmem>>, vector<16x4xf32>
    tpu.vector_store %arg15[%c0_41, %c8], %90 {strides = array<i32>} : memref<16x32xf32, #tpu.memory_space<vmem>>, vector<16x4xf32>,
    %92 = vector.extract_strided_slice %39 {offsets = [0, 0, 12], sizes = [2, 8, 4], strides = [1, 1, 1]} : vector<2x8x32xf32> to vector<2x8x4xf32>
    %93 = vector.extract_strided_slice %41 {offsets = [0, 0, 12], sizes = [2, 8, 4], strides = [1, 1, 1]} : vector<2x8x32xf32> to vector<2x8x4xf32>
    %94 = vector.extract_strided_slice %43 {offsets = [0, 0, 12], sizes = [2, 8, 4], strides = [1, 1, 1]} : vector<2x8x32xf32> to vector<2x8x4xf32>
    "tpu.trace_start"() <{level = 10 : i32, message = "bqe,bke->bqk"}> : () -> ()
    %cst_42 = arith.constant dense<0.000000e+00> : vector<2x8x8xf32>
    %95 = tpu.matmul %92, %93, %cst_42 {dimension_numbers = #tpu.dot_dimension_numbers<[2], [2], [1], [1], [0, 0, 0, 1, 1, 1], [0], [0]>} : vector<2x8x4xf32>, vector<2x8x4xf32>, vector<2x8x8xf32> -> vector<2x8x8xf32>
    "tpu.trace_stop"() : () -> ()
    %cst_43 = arith.constant dense<0xFF800000> : vector<2x8xf32>
    %96 = vector.multi_reduction <maximumf>, %95, %cst_43 [2] : vector<2x8x8xf32> to vector<2x8xf32>
    %97 = vector.shape_cast %96 : vector<2x8xf32> to vector<2x8x1xf32>
    %98 = vector.broadcast %97 : vector<2x8x1xf32> to vector<2x8x8xf32>
    %99 = arith.subf %95, %98 : vector<2x8x8xf32>
    %100 = math.exp %99 : vector<2x8x8xf32>
    %cst_44 = arith.constant dense<0.000000e+00> : vector<2x8xf32>
    %101 = vector.multi_reduction <add>, %100, %cst_44 [2] : vector<2x8x8xf32> to vector<2x8xf32>
    %102 = vector.shape_cast %101 : vector<2x8xf32> to vector<2x8x1xf32>
    %103 = vector.broadcast %102 : vector<2x8x1xf32> to vector<2x8x8xf32>
    %104 = arith.divf %100, %103 : vector<2x8x8xf32>
    "tpu.trace_start"() <{level = 10 : i32, message = "bqk,bke->bqe"}> : () -> ()
    %cst_45 = arith.constant dense<0.000000e+00> : vector<2x8x4xf32>
    %105 = tpu.matmul %104, %94, %cst_45 {dimension_numbers = #tpu.dot_dimension_numbers<[2], [1], [1], [2], [0, 0, 0, 1, 1, 2], [0], [0]>} : vector<2x8x8xf32>, vector<2x8x4xf32>, vector<2x8x4xf32> -> vector<2x8x4xf32>
    "tpu.trace_stop"() : () -> ()
    %106 = vector.shape_cast %105 : vector<2x8x4xf32> to vector<16x4xf32>
    %c0_46 = arith.constant 0 : index
    %c12 = arith.constant 12 : index
    %107 = vector.load %arg15[%c0_46, %c12] : memref<16x32xf32, #tpu.memory_space<vmem>>, vector<16x4xf32>
    tpu.vector_store %arg15[%c0_46, %c12], %106 {strides = array<i32>} : memref<16x32xf32, #tpu.memory_space<vmem>>, vector<16x4xf32>,
    %108 = vector.extract_strided_slice %39 {offsets = [0, 0, 16], sizes = [2, 8, 4], strides = [1, 1, 1]} : vector<2x8x32xf32> to vector<2x8x4xf32>
    %109 = vector.extract_strided_slice %41 {offsets = [0, 0, 16], sizes = [2, 8, 4], strides = [1, 1, 1]} : vector<2x8x32xf32> to vector<2x8x4xf32>
    %110 = vector.extract_strided_slice %43 {offsets = [0, 0, 16], sizes = [2, 8, 4], strides = [1, 1, 1]} : vector<2x8x32xf32> to vector<2x8x4xf32>
    "tpu.trace_start"() <{level = 10 : i32, message = "bqe,bke->bqk"}> : () -> ()
    %cst_47 = arith.constant dense<0.000000e+00> : vector<2x8x8xf32>
    %111 = tpu.matmul %108, %109, %cst_47 {dimension_numbers = #tpu.dot_dimension_numbers<[2], [2], [1], [1], [0, 0, 0, 1, 1, 1], [0], [0]>} : vector<2x8x4xf32>, vector<2x8x4xf32>, vector<2x8x8xf32> -> vector<2x8x8xf32>
    "tpu.trace_stop"() : () -> ()
    %cst_48 = arith.constant dense<0xFF800000> : vector<2x8xf32>
    %112 = vector.multi_reduction <maximumf>, %111, %cst_48 [2] : vector<2x8x8xf32> to vector<2x8xf32>
    %113 = vector.shape_cast %112 : vector<2x8xf32> to vector<2x8x1xf32>
    %114 = vector.broadcast %113 : vector<2x8x1xf32> to vector<2x8x8xf32>
    %115 = arith.subf %111, %114 : vector<2x8x8xf32>
    %116 = math.exp %115 : vector<2x8x8xf32>
    %cst_49 = arith.constant dense<0.000000e+00> : vector<2x8xf32>
    %117 = vector.multi_reduction <add>, %116, %cst_49 [2] : vector<2x8x8xf32> to vector<2x8xf32>
    %118 = vector.shape_cast %117 : vector<2x8xf32> to vector<2x8x1xf32>
    %119 = vector.broadcast %118 : vector<2x8x1xf32> to vector<2x8x8xf32>
    %120 = arith.divf %116, %119 : vector<2x8x8xf32>
    "tpu.trace_start"() <{level = 10 : i32, message = "bqk,bke->bqe"}> : () -> ()
    %cst_50 = arith.constant dense<0.000000e+00> : vector<2x8x4xf32>
    %121 = tpu.matmul %120, %110, %cst_50 {dimension_numbers = #tpu.dot_dimension_numbers<[2], [1], [1], [2], [0, 0, 0, 1, 1, 2], [0], [0]>} : vector<2x8x8xf32>, vector<2x8x4xf32>, vector<2x8x4xf32> -> vector<2x8x4xf32>
    "tpu.trace_stop"() : () -> ()
    %122 = vector.shape_cast %121 : vector<2x8x4xf32> to vector<16x4xf32>
    %c0_51 = arith.constant 0 : index
    %c16 = arith.constant 16 : index
    %123 = vector.load %arg15[%c0_51, %c16] : memref<16x32xf32, #tpu.memory_space<vmem>>, vector<16x4xf32>
    tpu.vector_store %arg15[%c0_51, %c16], %122 {strides = array<i32>} : memref<16x32xf32, #tpu.memory_space<vmem>>, vector<16x4xf32>,
    %124 = vector.extract_strided_slice %39 {offsets = [0, 0, 20], sizes = [2, 8, 4], strides = [1, 1, 1]} : vector<2x8x32xf32> to vector<2x8x4xf32>
    %125 = vector.extract_strided_slice %41 {offsets = [0, 0, 20], sizes = [2, 8, 4], strides = [1, 1, 1]} : vector<2x8x32xf32> to vector<2x8x4xf32>
    %126 = vector.extract_strided_slice %43 {offsets = [0, 0, 20], sizes = [2, 8, 4], strides = [1, 1, 1]} : vector<2x8x32xf32> to vector<2x8x4xf32>
    "tpu.trace_start"() <{level = 10 : i32, message = "bqe,bke->bqk"}> : () -> ()
    %cst_52 = arith.constant dense<0.000000e+00> : vector<2x8x8xf32>
    %127 = tpu.matmul %124, %125, %cst_52 {dimension_numbers = #tpu.dot_dimension_numbers<[2], [2], [1], [1], [0, 0, 0, 1, 1, 1], [0], [0]>} : vector<2x8x4xf32>, vector<2x8x4xf32>, vector<2x8x8xf32> -> vector<2x8x8xf32>
    "tpu.trace_stop"() : () -> ()
    %cst_53 = arith.constant dense<0xFF800000> : vector<2x8xf32>
    %128 = vector.multi_reduction <maximumf>, %127, %cst_53 [2] : vector<2x8x8xf32> to vector<2x8xf32>
    %129 = vector.shape_cast %128 : vector<2x8xf32> to vector<2x8x1xf32>
    %130 = vector.broadcast %129 : vector<2x8x1xf32> to vector<2x8x8xf32>
    %131 = arith.subf %127, %130 : vector<2x8x8xf32>
    %132 = math.exp %131 : vector<2x8x8xf32>
    %cst_54 = arith.constant dense<0.000000e+00> : vector<2x8xf32>
    %133 = vector.multi_reduction <add>, %132, %cst_54 [2] : vector<2x8x8xf32> to vector<2x8xf32>
    %134 = vector.shape_cast %133 : vector<2x8xf32> to vector<2x8x1xf32>
    %135 = vector.broadcast %134 : vector<2x8x1xf32> to vector<2x8x8xf32>
    %136 = arith.divf %132, %135 : vector<2x8x8xf32>
    "tpu.trace_start"() <{level = 10 : i32, message = "bqk,bke->bqe"}> : () -> ()
    %cst_55 = arith.constant dense<0.000000e+00> : vector<2x8x4xf32>
    %137 = tpu.matmul %136, %126, %cst_55 {dimension_numbers = #tpu.dot_dimension_numbers<[2], [1], [1], [2], [0, 0, 0, 1, 1, 2], [0], [0]>} : vector<2x8x8xf32>, vector<2x8x4xf32>, vector<2x8x4xf32> -> vector<2x8x4xf32>
    "tpu.trace_stop"() : () -> ()
    %138 = vector.shape_cast %137 : vector<2x8x4xf32> to vector<16x4xf32>
    %c0_56 = arith.constant 0 : index
    %c20 = arith.constant 20 : index
    %139 = vector.load %arg15[%c0_56, %c20] : memref<16x32xf32, #tpu.memory_space<vmem>>, vector<16x4xf32>
    tpu.vector_store %arg15[%c0_56, %c20], %138 {strides = array<i32>} : memref<16x32xf32, #tpu.memory_space<vmem>>, vector<16x4xf32>,
    %140 = vector.extract_strided_slice %39 {offsets = [0, 0, 24], sizes = [2, 8, 4], strides = [1, 1, 1]} : vector<2x8x32xf32> to vector<2x8x4xf32>
    %141 = vector.extract_strided_slice %41 {offsets = [0, 0, 24], sizes = [2, 8, 4], strides = [1, 1, 1]} : vector<2x8x32xf32> to vector<2x8x4xf32>
    %142 = vector.extract_strided_slice %43 {offsets = [0, 0, 24], sizes = [2, 8, 4], strides = [1, 1, 1]} : vector<2x8x32xf32> to vector<2x8x4xf32>
    "tpu.trace_start"() <{level = 10 : i32, message = "bqe,bke->bqk"}> : () -> ()
    %cst_57 = arith.constant dense<0.000000e+00> : vector<2x8x8xf32>
    %143 = tpu.matmul %140, %141, %cst_57 {dimension_numbers = #tpu.dot_dimension_numbers<[2], [2], [1], [1], [0, 0, 0, 1, 1, 1], [0], [0]>} : vector<2x8x4xf32>, vector<2x8x4xf32>, vector<2x8x8xf32> -> vector<2x8x8xf32>
    "tpu.trace_stop"() : () -> ()
    %cst_58 = arith.constant dense<0xFF800000> : vector<2x8xf32>
    %144 = vector.multi_reduction <maximumf>, %143, %cst_58 [2] : vector<2x8x8xf32> to vector<2x8xf32>
    %145 = vector.shape_cast %144 : vector<2x8xf32> to vector<2x8x1xf32>
    %146 = vector.broadcast %145 : vector<2x8x1xf32> to vector<2x8x8xf32>
    %147 = arith.subf %143, %146 : vector<2x8x8xf32>
    %148 = math.exp %147 : vector<2x8x8xf32>
    %cst_59 = arith.constant dense<0.000000e+00> : vector<2x8xf32>
    %149 = vector.multi_reduction <add>, %148, %cst_59 [2] : vector<2x8x8xf32> to vector<2x8xf32>
    %150 = vector.shape_cast %149 : vector<2x8xf32> to vector<2x8x1xf32>
    %151 = vector.broadcast %150 : vector<2x8x1xf32> to vector<2x8x8xf32>
    %152 = arith.divf %148, %151 : vector<2x8x8xf32>
    "tpu.trace_start"() <{level = 10 : i32, message = "bqk,bke->bqe"}> : () -> ()
    %cst_60 = arith.constant dense<0.000000e+00> : vector<2x8x4xf32>
    %153 = tpu.matmul %152, %142, %cst_60 {dimension_numbers = #tpu.dot_dimension_numbers<[2], [1], [1], [2], [0, 0, 0, 1, 1, 2], [0], [0]>} : vector<2x8x8xf32>, vector<2x8x4xf32>, vector<2x8x4xf32> -> vector<2x8x4xf32>
    "tpu.trace_stop"() : () -> ()
    %154 = vector.shape_cast %153 : vector<2x8x4xf32> to vector<16x4xf32>
    %c0_61 = arith.constant 0 : index
    %c24 = arith.constant 24 : index
    %155 = vector.load %arg15[%c0_61, %c24] : memref<16x32xf32, #tpu.memory_space<vmem>>, vector<16x4xf32>
    tpu.vector_store %arg15[%c0_61, %c24], %154 {strides = array<i32>} : memref<16x32xf32, #tpu.memory_space<vmem>>, vector<16x4xf32>,
    %156 = vector.extract_strided_slice %39 {offsets = [0, 0, 28], sizes = [2, 8, 4], strides = [1, 1, 1]} : vector<2x8x32xf32> to vector<2x8x4xf32>
    %157 = vector.extract_strided_slice %41 {offsets = [0, 0, 28], sizes = [2, 8, 4], strides = [1, 1, 1]} : vector<2x8x32xf32> to vector<2x8x4xf32>
    %158 = vector.extract_strided_slice %43 {offsets = [0, 0, 28], sizes = [2, 8, 4], strides = [1, 1, 1]} : vector<2x8x32xf32> to vector<2x8x4xf32>
    "tpu.trace_start"() <{level = 10 : i32, message = "bqe,bke->bqk"}> : () -> ()
    %cst_62 = arith.constant dense<0.000000e+00> : vector<2x8x8xf32>
    %159 = tpu.matmul %156, %157, %cst_62 {dimension_numbers = #tpu.dot_dimension_numbers<[2], [2], [1], [1], [0, 0, 0, 1, 1, 1], [0], [0]>} : vector<2x8x4xf32>, vector<2x8x4xf32>, vector<2x8x8xf32> -> vector<2x8x8xf32>
    "tpu.trace_stop"() : () -> ()
    %cst_63 = arith.constant dense<0xFF800000> : vector<2x8xf32>
    %160 = vector.multi_reduction <maximumf>, %159, %cst_63 [2] : vector<2x8x8xf32> to vector<2x8xf32>
    %161 = vector.shape_cast %160 : vector<2x8xf32> to vector<2x8x1xf32>
    %162 = vector.broadcast %161 : vector<2x8x1xf32> to vector<2x8x8xf32>
    %163 = arith.subf %159, %162 : vector<2x8x8xf32>
    %164 = math.exp %163 : vector<2x8x8xf32>
    %cst_64 = arith.constant dense<0.000000e+00> : vector<2x8xf32>
    %165 = vector.multi_reduction <add>, %164, %cst_64 [2] : vector<2x8x8xf32> to vector<2x8xf32>
    %166 = vector.shape_cast %165 : vector<2x8xf32> to vector<2x8x1xf32>
    %167 = vector.broadcast %166 : vector<2x8x1xf32> to vector<2x8x8xf32>
    %168 = arith.divf %164, %167 : vector<2x8x8xf32>
    "tpu.trace_start"() <{level = 10 : i32, message = "bqk,bke->bqe"}> : () -> ()
    %cst_65 = arith.constant dense<0.000000e+00> : vector<2x8x4xf32>
    %169 = tpu.matmul %168, %158, %cst_65 {dimension_numbers = #tpu.dot_dimension_numbers<[2], [1], [1], [2], [0, 0, 0, 1, 1, 2], [0], [0]>} : vector<2x8x8xf32>, vector<2x8x4xf32>, vector<2x8x4xf32> -> vector<2x8x4xf32>
    "tpu.trace_stop"() : () -> ()
    %170 = vector.shape_cast %169 : vector<2x8x4xf32> to vector<16x4xf32>
    %c0_66 = arith.constant 0 : index
    %c28 = arith.constant 28 : index
    %171 = vector.load %arg15[%c0_66, %c28] : memref<16x32xf32, #tpu.memory_space<vmem>>, vector<16x4xf32>
    tpu.vector_store %arg15[%c0_66, %c28], %170 {strides = array<i32>} : memref<16x32xf32, #tpu.memory_space<vmem>>, vector<16x4xf32>,
    %c0_67 = arith.constant 0 : index
    %c0_68 = arith.constant 0 : index
    %172 = vector.load %arg15[%c0_67, %c0_68] : memref<16x32xf32, #tpu.memory_space<vmem>>, vector<16x32xf32>
    %c0_69 = arith.constant 0 : index
    %c0_70 = arith.constant 0 : index
    %173 = vector.load %arg6[%c0_69, %c0_70] : memref<32x32xf32, #tpu.memory_space<vmem>>, vector<32x32xf32>
    %cst_71 = arith.constant dense<0.000000e+00> : vector<16x32xf32>
    %174 = tpu.matmul %172, %173, %cst_71 {dimension_numbers = #tpu.dot_dimension_numbers<[1], [0], [0], [1], [0, 0, 1, 1], [], []>} : vector<16x32xf32>, vector<32x32xf32>, vector<16x32xf32> -> vector<16x32xf32>
    %175 = vector.broadcast %7 : vector<1x32xf32> to vector<16x32xf32>
    %176 = arith.addf %174, %175 : vector<16x32xf32>
    %177 = arith.addf %1, %176 : vector<16x32xf32>
    %cst_72 = arith.constant dense<0.000000e+00> : vector<16xf32>
    %178 = vector.multi_reduction <add>, %177, %cst_72 [1] : vector<16x32xf32> to vector<16xf32>
    %179 = vector.shape_cast %178 : vector<16xf32> to vector<16x1xf32>
    %cst_73 = arith.constant 3.200000e+01 : f32
    %180 = vector.broadcast %cst_73 : f32 to vector<16x1xf32>
    %181 = arith.divf %179, %180 : vector<16x1xf32>
    %182 = vector.broadcast %181 : vector<16x1xf32> to vector<16x32xf32>
    %183 = arith.subf %177, %182 : vector<16x32xf32>
    %184 = arith.mulf %183, %183 : vector<16x32xf32>
    %cst_74 = arith.constant dense<0.000000e+00> : vector<16xf32>
    %185 = vector.multi_reduction <add>, %184, %cst_74 [1] : vector<16x32xf32> to vector<16xf32>
    %186 = vector.shape_cast %185 : vector<16xf32> to vector<16x1xf32>
    %cst_75 = arith.constant 3.200000e+01 : f32
    %187 = vector.broadcast %cst_75 : f32 to vector<16x1xf32>
    %188 = arith.divf %186, %187 : vector<16x1xf32>
    %189 = vector.broadcast %181 : vector<16x1xf32> to vector<16x32xf32>
    %190 = arith.subf %177, %189 : vector<16x32xf32>
    %cst_76 = arith.constant 9.99999974E-6 : f32
    %191 = vector.broadcast %cst_76 : f32 to vector<16x1xf32>
    %192 = arith.addf %188, %191 : vector<16x1xf32>
    %193 = math.rsqrt %192 : vector<16x1xf32>
    %194 = vector.broadcast %193 : vector<16x1xf32> to vector<16x32xf32>
    %195 = arith.mulf %190, %194 : vector<16x32xf32>
    %196 = vector.broadcast %4 : vector<1x32xf32> to vector<16x32xf32>
    %197 = arith.mulf %195, %196 : vector<16x32xf32>
    %198 = vector.broadcast %5 : vector<1x32xf32> to vector<16x32xf32>
    %199 = arith.addf %197, %198 : vector<16x32xf32>
    %c0_77 = arith.constant 0 : index
    %c0_78 = arith.constant 0 : index
    %200 = vector.load %arg10[%c0_77, %c0_78] : memref<32x32xf32, #tpu.memory_space<vmem>>, vector<32x32xf32>
    %cst_79 = arith.constant dense<0.000000e+00> : vector<16x32xf32>
    %201 = tpu.matmul %199, %200, %cst_79 {dimension_numbers = #tpu.dot_dimension_numbers<[1], [0], [0], [1], [0, 0, 1, 1], [], []>} : vector<16x32xf32>, vector<32x32xf32>, vector<16x32xf32> -> vector<16x32xf32>
    %202 = vector.broadcast %8 : vector<1x32xf32> to vector<16x32xf32>
    %203 = arith.addf %201, %202 : vector<16x32xf32>
    %cst_80 = arith.constant 0.000000e+00 : f32
    %204 = vector.broadcast %cst_80 : f32 to vector<16x32xf32>
    %205 = arith.subf %204, %203 : vector<16x32xf32>
    %206 = math.exp %205 : vector<16x32xf32>
    %cst_81 = arith.constant 1.000000e+00 : f32
    %207 = vector.broadcast %cst_81 : f32 to vector<16x32xf32>
    %208 = arith.addf %207, %206 : vector<16x32xf32>
    %209 = arith.divf %203, %208 : vector<16x32xf32>
    %c0_82 = arith.constant 0 : index
    %c0_83 = arith.constant 0 : index
    %210 = vector.load %arg12[%c0_82, %c0_83] : memref<32x32xf32, #tpu.memory_space<vmem>>, vector<32x32xf32>
    %cst_84 = arith.constant dense<0.000000e+00> : vector<16x32xf32>
    %211 = tpu.matmul %209, %210, %cst_84 {dimension_numbers = #tpu.dot_dimension_numbers<[1], [0], [0], [1], [0, 0, 1, 1], [], []>} : vector<16x32xf32>, vector<32x32xf32>, vector<16x32xf32> -> vector<16x32xf32>
    %212 = vector.broadcast %9 : vector<1x32xf32> to vector<16x32xf32>
    %213 = arith.addf %211, %212 : vector<16x32xf32>
    %214 = vector.shape_cast %213 : vector<16x32xf32> to vector<2x8x32xf32>
    %c0_85 = arith.constant 0 : index
    %c0_86 = arith.constant 0 : index
    %c0_87 = arith.constant 0 : index
    %215 = vector.load %arg14[%c0_85, %c0_86, %c0_87] : memref<2x8x32xf32, #tpu.memory_space<vmem>>, vector<2x8x32xf32>
    tpu.vector_store %arg14[%c0_85, %c0_86, %c0_87], %214 {strides = array<i32>} : memref<2x8x32xf32, #tpu.memory_space<vmem>>, vector<2x8x32xf32>,
    return
  }
  func.func @transform_0(%arg0: i32) -> (i32, i32, i32) {
    %c0_i32 = arith.constant 0 : i32
    %c0_i32_0 = arith.constant 0 : i32
    %c0_i32_1 = arith.constant 0 : i32
    return %arg0, %c0_i32, %c0_i32_0 : i32, i32, i32
  }
  func.func @transform_1(%arg0: i32) -> (i32, i32) {
    %c0_i32 = arith.constant 0 : i32
    %c0_i32_0 = arith.constant 0 : i32
    %c0_i32_1 = arith.constant 0 : i32
    return %c0_i32, %c0_i32_0 : i32, i32
  }
  func.func @transform_2(%arg0: i32) -> (i32, i32) {
    %c0_i32 = arith.constant 0 : i32
    %c0_i32_0 = arith.constant 0 : i32
    %c0_i32_1 = arith.constant 0 : i32
    return %c0_i32, %c0_i32_0 : i32, i32
  }
  func.func @transform_3(%arg0: i32) -> (i32, i32) {
    %c0_i32 = arith.constant 0 : i32
    %c0_i32_0 = arith.constant 0 : i32
    %c0_i32_1 = arith.constant 0 : i32
    return %c0_i32, %c0_i32_0 : i32, i32
  }
  func.func @transform_4(%arg0: i32) -> (i32, i32) {
    %c0_i32 = arith.constant 0 : i32
    %c0_i32_0 = arith.constant 0 : i32
    %c0_i32_1 = arith.constant 0 : i32
    return %c0_i32, %c0_i32_0 : i32, i32
  }
  func.func @transform_5(%arg0: i32) -> (i32, i32) {
    %c0_i32 = arith.constant 0 : i32
    %c0_i32_0 = arith.constant 0 : i32
    %c0_i32_1 = arith.constant 0 : i32
    return %c0_i32, %c0_i32_0 : i32, i32
  }
  func.func @transform_6(%arg0: i32) -> (i32, i32) {
    %c0_i32 = arith.constant 0 : i32
    %c0_i32_0 = arith.constant 0 : i32
    %c0_i32_1 = arith.constant 0 : i32
    return %c0_i32, %c0_i32_0 : i32, i32
  }
  func.func @transform_7(%arg0: i32) -> (i32, i32) {
    %c0_i32 = arith.constant 0 : i32
    %c0_i32_0 = arith.constant 0 : i32
    %c0_i32_1 = arith.constant 0 : i32
    return %c0_i32, %c0_i32_0 : i32, i32
  }
  func.func @transform_8(%arg0: i32) -> (i32, i32) {
    %c0_i32 = arith.constant 0 : i32
    %c0_i32_0 = arith.constant 0 : i32
    %c0_i32_1 = arith.constant 0 : i32
    return %c0_i32, %c0_i32_0 : i32, i32
  }
  func.func @transform_9(%arg0: i32) -> (i32, i32) {
    %c0_i32 = arith.constant 0 : i32
    %c0_i32_0 = arith.constant 0 : i32
    %c0_i32_1 = arith.constant 0 : i32
    return %c0_i32, %c0_i32_0 : i32, i32
  }
  func.func @transform_10(%arg0: i32) -> (i32, i32) {
    %c0_i32 = arith.constant 0 : i32
    %c0_i32_0 = arith.constant 0 : i32
    %c0_i32_1 = arith.constant 0 : i32
    return %c0_i32, %c0_i32_0 : i32, i32
  }
  func.func @transform_11(%arg0: i32) -> (i32, i32) {
    %c0_i32 = arith.constant 0 : i32
    %c0_i32_0 = arith.constant 0 : i32
    %c0_i32_1 = arith.constant 0 : i32
    return %c0_i32, %c0_i32_0 : i32, i32
  }
  func.func @transform_12(%arg0: i32) -> (i32, i32) {
    %c0_i32 = arith.constant 0 : i32
    %c0_i32_0 = arith.constant 0 : i32
    %c0_i32_1 = arith.constant 0 : i32
    return %c0_i32, %c0_i32_0 : i32, i32
  }
  func.func @transform_13(%arg0: i32) -> (i32, i32, i32) {
    %c0_i32 = arith.constant 0 : i32
    %c0_i32_0 = arith.constant 0 : i32
    %c0_i32_1 = arith.constant 0 : i32
    return %arg0, %c0_i32, %c0_i32_0 : i32, i32, i32
  }
}

</mosaic_0001>

<bundles_post_ra>
// kernel: tpu_custom_call.1
= control target key start
LH: loop header
LB: loop body
LE: loop exit
PB: predicated region body
PF: predicated region fallthrough
CT: control target
= control target key end

     0   :  { %s5313_s0 = inlined_call_operand.hbm [shape: f32[4,8,32], index: 0, kind: input, shape index: {}]   ;;  %s5314_s1 = inlined_call_operand.vmem [shape: f32[1,32], index: 1, kind: input, shape index: {}]   ;;  %s5315_s2 = inlined_call_operand.vmem [shape: f32[1,32], index: 2, kind: input, shape index: {}]   ;;  %s5316_s3 = inlined_call_operand.hbm [shape: f32[32,96], index: 3, kind: input, shape index: {}]   ;;  %s5317_s4 = inlined_call_operand.vmem [shape: f32[1,96], index: 4, kind: input, shape index: {}]   ;;  %s5318_s5 = inlined_call_operand.hbm [shape: f32[32,32], index: 5, kind: input, shape index: {}]   ;;  %s5319_s6 = inlined_call_operand.vmem [shape: f32[1,32], index: 6, kind: input, shape index: {}]   ;;  %s5320_s7 = inlined_call_operand.vmem [shape: f32[1,32], index: 7, kind: input, shape index: {}]   ;;  %s5321_s8 = inlined_call_operand.vmem [shape: f32[1,32], index: 8, kind: input, shape index: {}]   ;;  %s5322_s9 = inlined_call_operand.hbm [shape: f32[32,32], index: 9, kind: input, shape index: {}]   ;;  %s5323_s10 = inlined_call_operand.vmem [shape: f32[1,32], index: 10, kind: input, shape index: {}]   ;;  %s5324_s11 = inlined_call_operand.hbm [shape: f32[32,32], index: 11, kind: input, shape index: {}]   ;;  %s5325_s12 = inlined_call_operand.vmem [shape: f32[1,32], index: 12, kind: input, shape index: {}]   ;;  %s5326_s13 = inlined_call_operand.hbm [shape: f32[4,8,32], index: 13, kind: output, shape index: {}]  }
   0x1   :  { %5335 = sst [smem:[#allocation20_spill]] %s5316_s3 }
   0x2   :  { %5336 = sst [smem:[#allocation21_spill]] %s5318_s5 }
   0x3   :  { %5337 = sst [smem:[#allocation22_spill]] %s5322_s9 }
   0x4   :  { %5338 = sst [smem:[#allocation23_spill]] %s5324_s11 }
   0x5   :  { %18 = vsyncpa [#allocation4], 0 }
   0x6   :  { %20 = vsyncpa [#allocation4 + $0x1], 0 }
   0x7   :  { %21 = vsyncpa [#allocation7], 0 }
   0x8   :  { %22 = vsyncpa [#allocation10], 0 }
   0x9   :  { %23 = vsyncpa [#allocation5], 0 }
   0xa   :  { %25 = vsyncpa [#allocation5 + $0x1], 0  ;;  %s4746_s25 = smov 0   ;;  %s4748_s26 = smov 0  }
   0xb   :  { %s4750_s27 = smov 0   ;;  %s4752_s28 = smov 0  }
   0xc LB: > { %5339 = sst [smem:[#allocation17_spill]] %s4621_s25  ;;  %s4767_s29 = sadd.s32 4294967295, %s4633_s28   ;;  %s4633_s28 = sphi %s4752_s28, %s5369_s28   ;;  %s4629_s27 = sphi %s4750_s27, %s5368_s27   ;;  %s4625_s26 = sphi %s4748_s26, %s5367_s26   ;;  %s4621_s25 = sphi %s4746_s25, %s5366_s25  }
   0xd   : > { %s3845_s30 = sadd.s32 4294967294, %s4633_s28   ;;  %p51_p0 = scmp.ne.s32.totalorder %s4625_s26, %s4621_s25 }
   0xe   : > { %p5329_p1 = scmp.eq.s32.totalorder %s4767_s29, 0  ;;  %p327_p2 = scmp.eq.s32.totalorder %s4767_s29, 1 }
   0xf   : > { %p333_p3 = scmp.eq.s32.totalorder %s3845_s30, 1  ;;  %p3846_p5 = scmp.ge.s32.totalorder %s4633_s28, 1 }
  0x10   : > { %p4776_p4 = por %p5329_p1, %p51_p0  ;;  %p340_p7 = scmp.lt.s32.totalorder %s4633_s28, 3 }
  0x11   : > { %p4781_p6 = por %p333_p3, %p51_p0  ;;  %s4635_s17 = smov [#allocation6]  }
  0x12   : > { %s5340_s14 = scalar_select %p4776_p4, 1, 0 }
  0x13   : > { %s5341_s15 = scalar_select %p4781_p6, 1, 0 }
  0x14   : > { %p4786_p8 = pnand %p3846_p5, %p340_p7  ;;  %s358_s18 = sshll.u32 %s4635_s17, 4  ;;  %s359_s18 = int_to_ptr.vmem [resolvable:$true] %s358_s18 }
  0x15   : > { %5342 = sst [smem:[#allocation18_spill]] %s5341_s15  ;;  %s4636_s20 = smov [#allocation9]  }
  0x16   : > { %s5343_s16 = scalar_select %p4786_p8, 1, 0 }
  0x17   : > { %p4245_p9 = pneg %p4786_p8  ;;  %s396_s21 = sshll.u32 %s4636_s20, 4  ;;  %s397_s21 = int_to_ptr.vmem [resolvable:$true] %s396_s21 }
  0x18   : > { %s4637_s22 = smov [#allocation8]   ;;  %s4440_s24 = scalar_lea.vmem %s359_s18, 512 }
  0x19   : > { %p4795_p11 = pnand %p4245_p9, %p5329_p1  ;;  %s374_s23 = sshll.u32 %s4637_s22, 4  ;;  %s375_s23 = int_to_ptr.vmem [resolvable:$true] %s374_s23 }
  0x1a   : > { %p4441_p13 = scmp.ne.s32.totalorder %s359_s18, %s4440_s24  ;;  %p4448_p5 = scmp.lt.s32.totalorder %s359_s18, %s359_s18 }
  0x1b   : > { %p4431_p12 = pneg %p4795_p11  ;;  %p4449_p7 = scmp.lt.s32.totalorder %s4440_s24, %s4440_s24 }
  0x1d   : > { %p4443_p0 = pnand %p4441_p13, %p4431_p12  ;;  %p4450_p9 = por %p4449_p7, %p4448_p5 }
  0x1f   : > { %p4444_p3 = pneg %p4443_p0 }
  0x21   : > { %p4451_p10 = pnand %p4450_p9, %p4444_p3 }
  0x23   : > { %4454 = shalt.err (!%p4451_p10)
}
  0x24   : > { %s5330_s30 = smov 128   ;;  %s5331_s17 = smov 8  }
  0x25   : > { %s5345_s3 = sld [smem:[#allocation20_spill]]  ;;  %s4466_s15 = scalar_lea.vmem %s397_s21, 512 }
  0x26   : > { %p4467_p13 = scmp.ne.s32.totalorder %s397_s21, %s4466_s15  ;;  %p4474_p3 = scmp.lt.s32.totalorder %s397_s21, %s397_s21 }
  0x27   : > { %p4475_p10 = scmp.lt.s32.totalorder %s4466_s15, %s4466_s15 }
  0x28   : > { %p4469_p0 = pnand %p4467_p13, %p4431_p12 }
  0x29   : > { %p4476_p7 = por %p4475_p10, %p4474_p3 }
  0x2a   : > { %p4470_p5 = pneg %p4469_p0 }
  0x2b   : > { %4248 = dma.hbm_to_vmem [thread:$0]  (!%p4795_p11), %s5345_s3, 512, %s359_s18, [#allocation7], %s5330_s30, %s5330_s30, %s5331_s17  }
  0x2c   : > { %p4477_p9 = pnand %p4476_p7, %p4470_p5 }
  0x2e   : > { %4480 = shalt.err (!%p4477_p9)
}
  0x2f   : > { %s5346_s9 = sld [smem:[#allocation22_spill]]  ;;  %s4492_s18 = scalar_lea.vmem %s375_s23, 512 }
  0x30   : > { %p4493_p1 = scmp.ne.s32.totalorder %s375_s23, %s4492_s18  ;;  %p4500_p3 = scmp.lt.s32.totalorder %s375_s23, %s375_s23 }
  0x31   : > { %p4501_p5 = scmp.lt.s32.totalorder %s4492_s18, %s4492_s18 }
  0x32   : > { %p4495_p13 = pnand %p4493_p1, %p4431_p12 }
  0x33   : > { %p4502_p10 = por %p4501_p5, %p4500_p3 }
  0x34   : > { %p4496_p0 = pneg %p4495_p13 }
  0x35   : > { %4254 = dma.hbm_to_vmem [thread:$0]  (!%p4795_p11), %s5346_s9, 512, %s397_s21, [#allocation10], %s5330_s30, %s5330_s30, %s5331_s17  }
  0x36   : > { %p4503_p7 = pnand %p4502_p10, %p4496_p0 }
  0x38   : > { %4506 = shalt.err (!%p4503_p7)
}
  0x39   : > { %s5347_s5 = sld [smem:[#allocation21_spill]]  ;;  %s4640_s21 = smov [#allocation11]  }
  0x3a   : > { %s412_s20 = sshll.u32 %s4640_s21, 4  ;;  %s413_s20 = int_to_ptr.vmem [resolvable:$true] %s412_s20 }
  0x3b   : > { %s4518_s22 = scalar_lea.vmem %s413_s20, 512  ;;  %p4526_p0 = scmp.lt.s32.totalorder %s413_s20, %s413_s20 }
  0x3c   : > { %p4519_p1 = scmp.ne.s32.totalorder %s413_s20, %s4518_s22  ;;  %p4527_p3 = scmp.lt.s32.totalorder %s4518_s22, %s4518_s22 }
  0x3e   : > { %p4521_p9 = pnand %p4519_p1, %p4431_p12  ;;  %p4528_p5 = por %p4527_p3, %p4526_p0 }
  0x3f   : > { %4251 = dma.hbm_to_vmem [thread:$0]  (!%p4795_p11), %s5347_s5, 512, %s375_s23, [#allocation7], %s5330_s30, %s5330_s30, %s5331_s17  }
  0x40   : > { %p4522_p13 = pneg %p4521_p9 }
  0x42   : > { %p4529_p10 = pnand %p4528_p5, %p4522_p13 }
  0x44   : > { %4532 = shalt.err (!%p4529_p10)
}
  0x45   : > { %s5348_s11 = sld [smem:[#allocation23_spill]]  ;;  %s4846_s18 = sadd.s32 1, %s4633_s28  }
  0x46   : > { %s38_s19 = sadd.s32 1, %s4629_s27  ;;  %s35_s25 = ssub.s32 %s4633_s28, %s4846_s18 }
  0x47   : > { %p45_p12 = scmp.ne.s32.totalorder %s4629_s27, %s4625_s26  ;;  %p36_p7 = scmp.eq.s32.totalorder %s35_s25, 0 }
  0x48   : > { %p46_p1 = scmp.eq.s32.totalorder %s4633_s28, 0  ;;  %p4270_p13 = scmp.lt.s32.totalorder %s4633_s28, 2 }
  0x49   : > { %p4856_p9 = por %p327_p2, %p45_p12  ;;  %s429_s22 = sand.u32 1, %s4629_s27  }
  0x4a   : > { %s4862_s21 = scalar_select %p36_p7, %s4629_s27, %s38_s19  }
  0x4b   : > { %4257 = dma.hbm_to_vmem [thread:$0]  (!%p4795_p11), %s5348_s11, 512, %s413_s20, [#allocation10], %s5330_s30, %s5330_s30, %s5331_s17  }
  0x4c   : > { %s5349_s15 = scalar_select %p4856_p9, 1, 0 }
  0x4d   : > { %5350 = sst [smem:[#allocation19_spill]] %s4862_s21  ;;  %p47_p0 = por %p46_p1, %p45_p12 }
  0x4e   : > { %s3852_s23 = sshll.u32 %s429_s22, 4  ;;  %s3931_s20 = sshll.u32 %s4633_s28, 8 }
  0x4f   : > { %s4869_s17 = scalar_lea.hbm %s5313_s0, %s3931_s20  ;;  %s433_s25 = scalar_lea.vmem [#allocation3], %s3852_s23 }
  0x50   : > { %s440_s3 = sshll.u32 %s433_s25, 4  ;;  %p4873_p2 = pnand %p4270_p13, %p47_p0  ;;  %s4871_s3 = int_to_ptr.vmem [resolvable:$true] %s440_s3 }
  0x51   : > { %s4877_s19 = scalar_lea.sflag [#allocation4], %s429_s22  ;;  %s4533_s9 = scalar_lea.hbm %s4869_s17, 256 }
  0x52   : > { %p4534_p11 = scmp.ne.s32.totalorder %s4869_s17, %s4533_s9  ;;  %p4535_p3 = pneg %p4873_p2 }
  0x53   : > { %s4538_s23 = scalar_lea.hbm %s5313_s0, 512  ;;  %p4539_p12 = scmp.lt.s32.totalorder %s4869_s17, %s5313_s0 }
  0x54   : > { %p4536_p5 = pnand %p4535_p3, %p4534_p11  ;;  %p4540_p7 = scmp.lt.s32.totalorder %s4538_s23, %s4533_s9 }
  0x56   : > { %p4537_p10 = pneg %p4536_p5  ;;  %p4541_p1 = por %p4540_p7, %p4539_p12 }
  0x58   : > { %p4542_p13 = pnand %p4541_p1, %p4537_p10 }
  0x5a   : > { %4545 = shalt.err (!%p4542_p13)
}
  0x5b   : > { %s4546_s22 = scalar_lea.vmem %s4871_s3, 256  ;;  %s4641_s11 = smov [#allocation3]  }
  0x5c   : > { %p4547_p0 = scmp.ne.s32.totalorder %s4871_s3, %s4546_s22  ;;  %s4551_s21 = sshll.u32 %s4641_s11, 4  ;;  %s4552_s21 = int_to_ptr.vmem [resolvable:$false] %s4551_s21 }
  0x5d   : > { %s4553_s30 = scalar_lea.vmem %s4552_s21, 512  ;;  %p4554_p5 = scmp.lt.s32.totalorder %s4871_s3, %s4552_s21 }
  0x5e   : > { %p4549_p6 = pnand %p4547_p0, %p4535_p3  ;;  %p4555_p9 = scmp.lt.s32.totalorder %s4553_s30, %s4546_s22 }
  0x60   : > { %p4550_p11 = pneg %p4549_p6  ;;  %p4556_p4 = por %p4555_p9, %p4554_p5 }
  0x62   : > { %p4557_p8 = pnand %p4556_p4, %p4550_p11 }
  0x64   : > { %4560 = shalt.err (!%p4557_p8)
}
  0x65   : > { %s5352_s9 = smov 8   ;;  %s5353_s20 = smov 128  }
  0x66   : > { %4261 = dma.hbm_to_vmem [thread:$0]  (!%p4873_p2), %s4869_s17, 256, %s4871_s3, %s4877_s19, %s5353_s20, %s5353_s20, %s5352_s9  }
  0x67   : > { %p5354_p6 = scmp.ne.s32.totalorder %s5343_s16, 0 }
  0x68   : > { %s4904_s11 = sand.u32 (!%p5354_p6), 1, %s4625_s26   ;;  %p5355_p4 = scmp.ne.s32.totalorder (!%p5354_p6), %s5340_s14, 0 }
  0x69   : > { %452 = sbr.rel (%p5354_p6) target bundleno = 6311 (0x18a7), region = 72  ;;  %s3856_s21 = sshll.u32 (!%p5354_p6), %s4904_s11, 4 }
  0x6a   : > { %s455_s23 = scalar_lea.sflag (!%p5354_p6), [#allocation4], %s4904_s11  ;;  %s4910_s5 = scalar_lea.vmem (!%p5354_p6), [#allocation3], %s3856_s21 }
  0x6e   : > { %4604 = dma.done.wait (%p5355_p4), %s455_s23, 256  }
  0x6f   : > { %4606 = vsyncadd (%p5355_p4), %s455_s23, 4294967040  ;;  %p5356_p8 = scmp.eq.s32.totalorder %s4767_s29, 0 }
  0x71   : > { %4608 = dma.done.wait (%p5356_p8), [#allocation7], 1024   ;;  %p5357_p9 = pmov %p5356_p8 }
  0x72   : > { %p5358_p2 = pmov %p5356_p8 }
  0x73   : > { %4610 = vsyncadd (%p5357_p9), [#allocation7], 4294966272 }
  0x74   : > { %4612 = dma.done.wait (%p5358_p2), [#allocation10], 1024   ;;  %p5359_p3 = pmov %p5358_p2 }
  0x75   : > { %vm529_vm0 = vcmask 261120   ;;  %v519_v0 = vld [vmem:[%s4910_s5] sm:$0xff]  ;;  %v520_v1 = vld [vmem:[%s4910_s5 + $0x8] sm:$0xff]  ;;  %v4642_v34 = vmov 0.0   ;;  %vm4643_vm1 = vmmov 0   ;;  %s4644_s25 = smov 96  }
  0x76   : > { %4614 = vsyncadd (%p5359_p3), [#allocation10], 4294966272  ;;  %v530_v2 = vsel %vm529_vm0, %v519_v0, 0.0  ;;  %v533_v3 = vsel %vm529_vm0, %v520_v1, 0.0  ;;  %v576_v14 = vld [vmem:[#allocation6 + $0x18] sm:$0xff]  ;;  %v575_v15 = vld [vmem:[#allocation6 + $0x10] sm:$0xff]  ;;  %4032 = vmatprep.subr.mxu1 %v4642_v34  ;;  %4034 = vmatprep.mubr.msk.f32.mxu1 %vm4643_vm1, %v4642_v34 }
  0x77   : > { %531 = vadd.xlane.f32.xlu0 %v530_v2  ;;  %4021 = vmatprep.subr.mxu0 %v576_v14  ;;  %v574_v16 = vld [vmem:[#allocation6 + $0x8] sm:$0xff]  ;;  %v573_v17 = vld [vmem:[#allocation6] sm:$0xff]  ;;  %v3862_v25 = vld [vmem:[%s5314_s1] ss:$0 sm:$0xff]  ;;  %vm669_vm2 = vcmask 31744   ;;  %vm823_vm3 = vcmask 64512  }
  0x78   : > { %4022 = vmatpush3.msra.mxu0 %v576_v14  ;;  %v3863_v27 = vld [vmem:[%s5315_s2] ss:$0 sm:$0xff]  ;;  %s4645_s22 = smov 64   ;;  %s4646_s30 = smov 92   ;;  %vm1338_vm4 = vcmask 64544   ;;  %vm1679_vm5 = vcmask 97344  }
  0x79   : > { %4023 = vmatprep.subr.mxu0 %v575_v15  ;;  %v3864_v35 = vld [vmem:[%s5317_s4] ss:$0 sm:$0xff]  ;;  %s4647_s9 = smov 124   ;;  %s4648_s20 = smov 60   ;;  %vm2020_vm6 = vcmask 130144   ;;  %vm2361_vm7 = vcmask 162944  }
  0x7a   : > { %4024 = vmatpush3.msra.mxu0 %v575_v15  ;;  %s4649_s23 = smov 88   ;;  %s4650_s3 = smov 120   ;;  %vm2702_vm8 = vcmask 195744   ;;  %vm3043_vm9 = vcmask 228544   ;;  %vm3384_vm10 = vcmask 261344  }
  0x7b   : > { %534 = vadd.xlane.f32.xlu0 %v533_v3  ;;  %4025 = vmatprep.subr.mxu0 %v574_v16  ;;  %s4651_s14 = smov 56   ;;  %s4652_s16 = smov 84  }
  0x7c   : > { %4026 = vmatpush3.msra.mxu0 %v574_v16  ;;  %s4653_s17 = smov 116   ;;  %s4654_s19 = smov 52  }
  0x7d   : > { %4027 = vmatprep.subr.mxu0 %v573_v17  ;;  %s4655_s24 = smov 80   ;;  %p5360_p12 = scmp.ne.s32.totalorder %s5349_s15, 0 }
  0x7e   : > { %4028 = vmatpush3.msra.mxu0 %v573_v17 }
  0x7f   : > { %4052 = vmatprep.subr.mxu0 %v4642_v34 }
 0x100   : > { %v532_v4 = vpop.xlane.xlu0 %531 }
 0x101   : > { %v537_v5 = vmul.f32 0.03125, %v532_v4 }
 0x103   : > { %v539_v6 = vsub.f32 %v519_v0, %v537_v5 }
 0x104   : > { %v535_v7 = vpop.xlane.xlu0 %534 }
 0x105   : > { %v538_v8 = vmul.f32 0.03125, %v535_v7  ;;  %v541_v9 = vmul.f32 %v539_v6, %v539_v6 }
 0x107   : > { %v540_v10 = vsub.f32 %v520_v1, %v538_v8  ;;  %v543_v11 = vsel %vm529_vm0, %v541_v9, 0.0 }
 0x108   : > { %544 = vadd.xlane.f32.xlu1 %v543_v11 }
 0x109   : > { %v542_v12 = vmul.f32 %v540_v10, %v540_v10 }
 0x10b   : > { %v546_v13 = vsel %vm529_vm0, %v542_v12, 0.0 }
 0x10c   : > { %547 = vadd.xlane.f32.xlu1 %v546_v13 }
 0x191   : > { %v545_v18 = vpop.xlane.xlu1 %544 }
 0x192   : > { %v549_v19 = vmul.f32 0.03125, %v545_v18 }
 0x194   : > { %v551_v20 = vadd.f32 1e-05, %v549_v19 }
 0x195   : > { %v548_v21 = vpop.xlane.xlu1 %547 }
 0x196   : > { %4347 = vrsqrt.f32 %v551_v20  ;;  %v550_v22 = vmul.f32 0.03125, %v548_v21 }
 0x198   : > { %v552_v23 = vadd.f32 1e-05, %v550_v22 }
 0x19a   : > { %4349 = vrsqrt.f32 %v552_v23 }
 0x1a3   : > { %v4348_v24 = vpop.eup %4347 }
 0x1a4   : > { %v555_v26 = vmul.f32 %v4348_v24, %v539_v6 }
 0x1a6   : > { %v563_v28 = vmul.f32 %v3862_v25, %v555_v26 }
 0x1a7   : > { %v4350_v29 = vpop.eup %4349 }
 0x1a8   : > { %v556_v30 = vmul.f32 %v4350_v29, %v540_v10  ;;  %v571_v31 = vadd.f32 %v3863_v27, %v563_v28 }
 0x1aa   : > { %v564_v32 = vmul.f32 %v3862_v25, %v556_v30  ;;  %4029 = vmatprep.mubr.msk.f32.mxu0 %vm529_vm0, %v571_v31 }
 0x1ac   : > { %v572_v33 = vadd.f32 %v3863_v27, %v564_v32 }
 0x1ae   : > { %4030 = vmatmul.mubr.msk.f32.vlgmr.msra.gmra.mxu0 %vm529_vm0, %v572_v33 }
 0x1af   : > { %4054 = vmatprep.mubr.msk.f32.mxu0 %vm4643_vm1, %v4642_v34 }
 0x26e   : > { %v4031_v36 = vpop.f32.mrf.mxu0 }
 0x26f   : > { %v4947_v37 = vadd.f32 %v4031_v36, %v3864_v35 }
 0x270   : > { %v655_v38 = vpop.f32.mrf.mxu0 }
 0x271   : > { %v4949_v39 = vadd.f32 %v3864_v35, %v655_v38  ;;  %746 = vrot.lane.b32.xlu1 %v4947_v37, %s4644_s25  ;;  %v4964_v43 = vmul.f32 0.5, %v4947_v37 }
 0x273   : > { %667 = vrot.lane.b32.xlu0 %v4949_v39, %s4644_s25  ;;  %v4955_v41 = vmul.f32 0.5, %v4949_v39  ;;  %s4656_s25 = smov 112  }
 0x2e3   : > { %v747_v42 = vpop.permute.xlu1 %746 }
 0x2e5   : > { %v668_v40 = vpop.permute.xlu0 %667 }
 0x2e6   : > { %4033 = vmatpush3.xpose.msk.msra.mxu1 %vm669_vm2, %v668_v40 }
 0x2e7   : > { %4037 = vmatprep.subr.mxu1 %v4642_v34 }
 0x2e9   : > { %4035 = vmatmul.mubr.msk.f32.vlgmr.msra.gmra.mxu1 %vm669_vm2, %v4955_v41 }
 0x2ea   : > { %4038 = vmatpush3.xpose.msk.msra.mxu1 %vm669_vm2, %v747_v42  ;;  %4039 = vmatprep.mubr.msk.f32.mxu1 %vm4643_vm1, %v4642_v34 }
 0x2eb   : > { %4042 = vmatprep.subr.mxu1 %v4642_v34 }
 0x2ed   : > { %4040 = vmatmul.mubr.msk.f32.vlgmr.msra.gmra.mxu1 %vm669_vm2, %v4964_v43 }
 0x2ee   : > { %4044 = vmatprep.mubr.msk.f32.mxu1 %vm4643_vm1, %v4642_v34 }
 0x3a9   : > { %v741_v44 = vpop.f32.mrf.mxu1 }
 0x3aa   : > { %v824_v45 = vsel %vm823_vm3, %v741_v44, -inf }
 0x3ab   : > { %825 = vmax.xlane.f32.xlu1 %v824_v45  ;;  %v4036_v46 = vpop.f32.mrf.mxu1 }
 0x3ad   : > { %v819_v47 = vpop.f32.mrf.mxu1 }
 0x3ae   : > { %v827_v48 = vsel %vm823_vm3, %v819_v47, -inf }
 0x3af   : > { %828 = vmax.xlane.f32.xlu0 %v827_v48  ;;  %v4041_v49 = vpop.f32.mrf.mxu1 }
 0x3bc   : > { %922 = vrot.lane.b32.xlu1 %v4947_v37, %s4645_s22 }
 0x3c0   : > { %1002 = vrot.lane.b32.xlu1 %v4949_v39, %s4646_s30 }
 0x3c4   : > { %1080 = vrot.lane.b32.xlu1 %v4947_v37, %s4646_s30  ;;  %s4658_s30 = smov 76  }
 0x434   : > { %v826_v50 = vpop.xlane.xlu1 %825 }
 0x435   : > { %v830_v51 = vsub.f32 %v741_v44, %v826_v50 }
 0x437   : > { %v832_v52 = vmul.f32 1.442695, %v830_v51 }
 0x438   : > { %v923_v53 = vpop.permute.xlu1 %922  ;;  %v829_v54 = vpop.xlane.xlu0 %828 }
 0x439   : > { %4351 = vpow2.f32 %v832_v52  ;;  %v831_v55 = vsub.f32 %v819_v47, %v829_v54 }
 0x43b   : > { %v834_v56 = vmul.f32 1.442695, %v831_v55 }
 0x43c   : > { %v1003_v57 = vpop.permute.xlu1 %1002 }
 0x43d   : > { %4353 = vpow2.f32 %v834_v56  ;;  %4053 = vmatpush3.xpose.msk.msra.mxu0 %vm669_vm2, %v1003_v57 }
 0x43e   : > { %4062 = vmatprep.subr.mxu0 %v4642_v34 }
 0x440   : > { %v1081_v62 = vpop.permute.xlu1 %1080 }
 0x446   : > { %v4352_v58 = vpop.eup %4351 }
 0x447   : > { %v836_v59 = vsel %vm823_vm3, %v4352_v58, 0.0 }
 0x448   : > { %837 = vadd.xlane.f32.xlu0 %v836_v59 }
 0x44a   : > { %v4354_v60 = vpop.eup %4353 }
 0x44b   : > { %v839_v61 = vsel %vm823_vm3, %v4354_v60, 0.0 }
 0x44c   : > { %840 = vadd.xlane.f32.xlu1 %v839_v61 }
 0x45d   : > { %1078 = vrot.lane.b32.xlu1 %v4964_v43, %s4647_s9 }
 0x45e   : > { %846 = vrot.lane.b32.xlu0 %v4949_v39, %s4645_s22  ;;  %s4657_s22 = smov 48  }
 0x462   : > { %1000 = vrot.lane.b32.xlu0 %v4955_v41, %s4647_s9  ;;  %s4659_s9 = smov 108  }
 0x4d1   : > { %v838_v63 = vpop.xlane.xlu0 %837 }
 0x4d2   : > { %4355 = vrcp.f32 %v838_v63 }
 0x4d5   : > { %v841_v0 = vpop.xlane.xlu1 %840  ;;  %v847_v1 = vpop.permute.xlu0 %846 }
 0x4d6   : > { %4357 = vrcp.f32 %v841_v0  ;;  %4043 = vmatpush3.msra.mxu1 %v847_v1 }
 0x4d7   : > { %4047 = vmatprep.subr.mxu1 %v4642_v34 }
 0x4d9   : > { %v1001_v2 = vpop.permute.xlu0 %1000  ;;  %v1079_v7 = vpop.permute.xlu1 %1078 }
 0x4da   : > { %4055 = vmatmul.mubr.msk.f32.vlgmr.msra.gmra.mxu0 %vm669_vm2, %v1001_v2 }
 0x4db   : > { %4064 = vmatprep.mubr.msk.f32.mxu0 %vm4643_vm1, %v4642_v34 }
 0x4df   : > { %v4356_v3 = vpop.eup %4355 }
 0x4e0   : > { %v843_v4 = vmul.f32 %v4356_v3, %v4352_v58 }
 0x4e2   : > { %4045 = vmatmul.mubr.msk.f32.vlgmr.msra.gmra.mxu1 %vm823_vm3, %v843_v4 }
 0x4e3   : > { %v4358_v5 = vpop.eup %4357  ;;  %4048 = vmatpush3.msra.mxu1 %v923_v53  ;;  %4049 = vmatprep.mubr.msk.f32.mxu1 %vm4643_vm1, %v4642_v34 }
 0x4e4   : > { %4057 = vmatprep.subr.mxu1 %v4642_v34  ;;  %v845_v6 = vmul.f32 %v4358_v5, %v4354_v60 }
 0x4e6   : > { %4050 = vmatmul.mubr.msk.f32.vlgmr.msra.gmra.mxu1 %vm823_vm3, %v845_v6 }
 0x4e7   : > { %4058 = vmatpush3.xpose.msk.msra.mxu1 %vm669_vm2, %v1081_v62  ;;  %4059 = vmatprep.mubr.msk.f32.mxu1 %vm4643_vm1, %v4642_v34 }
 0x4e8   : > { %4067 = vmatprep.subr.mxu1 %v4642_v34 }
 0x4ea   : > { %4060 = vmatmul.mubr.msk.f32.vlgmr.msra.gmra.mxu1 %vm669_vm2, %v1079_v7 }
 0x4eb   : > { %4069 = vmatprep.mubr.msk.f32.mxu1 %vm4643_vm1, %v4642_v34 }
 0x59a   : > { %v1074_v8 = vpop.f32.mrf.mxu0 }
 0x59b   : > { %v1156_v9 = vsel %vm823_vm3, %v1074_v8, -inf }
 0x59c   : > { %1157 = vmax.xlane.f32.xlu0 %v1156_v9  ;;  %v4056_v10 = vpop.f32.mrf.mxu0 }
 0x5a2   : > { %v918_v11 = vpop.f32.mrf.mxu1 }
 0x5a3   : > { %998 = vst.msk [vmem:[#allocation2] sm:$0xff] %vm669_vm2, %v918_v11 }
 0x5a4   : > { %v4046_v12 = vpop.f32.mrf.mxu1 }
 0x5a6   : > { %v994_v13 = vpop.f32.mrf.mxu1 }
 0x5a7   : > { %999 = vst.msk [vmem:[#allocation2 + $0x8] sm:$0xff] %vm669_vm2, %v994_v13 }
 0x5a8   : > { %v4051_v14 = vpop.f32.mrf.mxu1 }
 0x5aa   : > { %v1152_v15 = vpop.f32.mrf.mxu1 }
 0x5ab   : > { %v1159_v16 = vsel %vm823_vm3, %v1152_v15, -inf }
 0x5ac   : > { %1160 = vmax.xlane.f32.xlu1 %v1159_v16  ;;  %v4061_v17 = vpop.f32.mrf.mxu1 }
 0x5bd   : > { %1254 = vrot.lane.b32.xlu1 %v4947_v37, %s4648_s20 }
 0x5c1   : > { %1343 = vrot.lane.b32.xlu1 %v4949_v39, %s4649_s23 }
 0x5c5   : > { %1421 = vrot.lane.b32.xlu1 %v4947_v37, %s4649_s23  ;;  %s4661_s23 = smov 72  }
 0x5c9   : > { %1419 = vrot.lane.b32.xlu1 %v4964_v43, %s4650_s3 }
 0x625   : > { %v1158_v18 = vpop.xlane.xlu0 %1157 }
 0x626   : > { %v1162_v19 = vsub.f32 %v1074_v8, %v1158_v18 }
 0x628   : > { %v1164_v20 = vmul.f32 1.442695, %v1162_v19 }
 0x62a   : > { %4359 = vpow2.f32 %v1164_v20 }
 0x635   : > { %v1161_v21 = vpop.xlane.xlu1 %1160 }
 0x636   : > { %v1163_v25 = vsub.f32 %v1152_v15, %v1161_v21 }
 0x637   : > { %v4360_v22 = vpop.eup %4359 }
 0x638   : > { %v1168_v23 = vsel %vm823_vm3, %v4360_v22, 0.0  ;;  %v1166_v26 = vmul.f32 1.442695, %v1163_v25 }
 0x639   : > { %1169 = vadd.xlane.f32.xlu0 %v1168_v23  ;;  %v1255_v24 = vpop.permute.xlu1 %1254 }
 0x63a   : > { %4068 = vmatpush3.msra.mxu1 %v1255_v24  ;;  %4361 = vpow2.f32 %v1166_v26 }
 0x63b   : > { %4077 = vmatprep.subr.mxu1 %v4642_v34 }
 0x63d   : > { %v1344_v33 = vpop.permute.xlu1 %1343 }
 0x641   : > { %v1422_v40 = vpop.permute.xlu1 %1421 }
 0x645   : > { %v1420_v44 = vpop.permute.xlu1 %1419 }
 0x647   : > { %v4362_v27 = vpop.eup %4361 }
 0x648   : > { %v1171_v28 = vsel %vm823_vm3, %v4362_v27, 0.0 }
 0x64f   : > { %1178 = vrot.lane.b32.xlu0 %v4949_v39, %s4648_s20  ;;  %s4660_s20 = smov 44  }
 0x66e   : > { %1172 = vadd.xlane.f32.xlu0 %v1171_v28 }
 0x684   : > { %1341 = vrot.lane.b32.xlu0 %v4955_v41, %s4650_s3  ;;  %s4662_s3 = smov 104  }
 0x6c2   : > { %v1170_v29 = vpop.xlane.xlu0 %1169 }
 0x6c3   : > { %4363 = vrcp.f32 %v1170_v29 }
 0x6c6   : > { %v1179_v30 = vpop.permute.xlu0 %1178 }
 0x6c7   : > { %4063 = vmatpush3.msra.mxu0 %v1179_v30 }
 0x6c8   : > { %4072 = vmatprep.subr.mxu0 %v4642_v34 }
 0x6d0   : > { %v4364_v31 = vpop.eup %4363 }
 0x6d1   : > { %v1175_v32 = vmul.f32 %v4364_v31, %v4360_v22 }
 0x6d3   : > { %4065 = vmatmul.mubr.msk.f32.vlgmr.msra.gmra.mxu0 %vm823_vm3, %v1175_v32 }
 0x6d4   : > { %4073 = vmatpush3.xpose.msk.msra.mxu0 %vm669_vm2, %v1344_v33  ;;  %4074 = vmatprep.mubr.msk.f32.mxu0 %vm4643_vm1, %v4642_v34 }
 0x6d5   : > { %4082 = vmatprep.subr.mxu0 %v4642_v34 }
 0x6f7   : > { %v1173_v35 = vpop.xlane.xlu0 %1172 }
 0x6f8   : > { %4365 = vrcp.f32 %v1173_v35 }
 0x6fb   : > { %v1342_v36 = vpop.permute.xlu0 %1341 }
 0x6fc   : > { %4075 = vmatmul.mubr.msk.f32.vlgmr.msra.gmra.mxu0 %vm669_vm2, %v1342_v36 }
 0x6fd   : > { %4084 = vmatprep.mubr.msk.f32.mxu0 %vm4643_vm1, %v4642_v34 }
 0x705   : > { %v4366_v38 = vpop.eup %4365 }
 0x706   : > { %v1177_v42 = vmul.f32 %v4366_v38, %v4362_v27 }
 0x708   : > { %4070 = vmatmul.mubr.msk.f32.vlgmr.msra.gmra.mxu1 %vm823_vm3, %v1177_v42 }
 0x709   : > { %4078 = vmatpush3.xpose.msk.msra.mxu1 %vm669_vm2, %v1422_v40  ;;  %4079 = vmatprep.mubr.msk.f32.mxu1 %vm4643_vm1, %v4642_v34 }
 0x70a   : > { %4087 = vmatprep.subr.mxu1 %v4642_v34 }
 0x70c   : > { %4080 = vmatmul.mubr.msk.f32.vlgmr.msra.gmra.mxu1 %vm669_vm2, %v1420_v44 }
 0x70d   : > { %4089 = vmatprep.mubr.msk.f32.mxu1 %vm4643_vm1, %v4642_v34 }
 0x793   : > { %v5029_v45 = vpop.f32.mrf.mxu0 }
 0x795   : > { %v4066_v46 = vpop.f32.mrf.mxu0 }
 0x7bc   : > { %v1415_v47 = vpop.f32.mrf.mxu0 }
 0x7bd   : > { %v1497_v48 = vsel %vm823_vm3, %v1415_v47, -inf }
 0x7be   : > { %1498 = vmax.xlane.f32.xlu0 %v1497_v48  ;;  %v4076_v49 = vpop.f32.mrf.mxu0 }
 0x7c8   : > { %v5032_v50 = vpop.f32.mrf.mxu1 }
 0x7ca   : > { %v4071_v51 = vpop.f32.mrf.mxu1 }
 0x7cc   : > { %v1493_v52 = vpop.f32.mrf.mxu1 }
 0x7cd   : > { %v1500_v53 = vsel %vm823_vm3, %v1493_v52, -inf }
 0x7ce   : > { %1501 = vmax.xlane.f32.xlu1 %v1500_v53  ;;  %v4081_v54 = vpop.f32.mrf.mxu1 }
 0x7df   : > { %1595 = vrot.lane.b32.xlu1 %v4947_v37, %s4651_s14 }
 0x7e3   : > { %1684 = vrot.lane.b32.xlu1 %v4949_v39, %s4652_s16 }
 0x7e7   : > { %1762 = vrot.lane.b32.xlu1 %v4947_v37, %s4652_s16  ;;  %s4664_s16 = smov 68  }
 0x7eb   : > { %1760 = vrot.lane.b32.xlu1 %v4964_v43, %s4653_s17 }
 0x847   : > { %v1499_v55 = vpop.xlane.xlu0 %1498 }
 0x848   : > { %v1503_v56 = vsub.f32 %v1415_v47, %v1499_v55 }
 0x84a   : > { %v1505_v57 = vmul.f32 1.442695, %v1503_v56 }
 0x84c   : > { %4367 = vpow2.f32 %v1505_v57 }
 0x857   : > { %v1502_v58 = vpop.xlane.xlu1 %1501 }
 0x858   : > { %v1504_v62 = vsub.f32 %v1493_v52, %v1502_v58 }
 0x859   : > { %v4368_v59 = vpop.eup %4367 }
 0x85a   : > { %v1509_v60 = vsel %vm823_vm3, %v4368_v59, 0.0  ;;  %v1507_v63 = vmul.f32 1.442695, %v1504_v62 }
 0x85b   : > { %1510 = vadd.xlane.f32.xlu0 %v1509_v60  ;;  %v1596_v61 = vpop.permute.xlu1 %1595 }
 0x85c   : > { %4088 = vmatpush3.msra.mxu1 %v1596_v61  ;;  %4369 = vpow2.f32 %v1507_v63 }
 0x85d   : > { %4097 = vmatprep.subr.mxu1 %v4642_v34 }
 0x85f   : > { %v1685_v6 = vpop.permute.xlu1 %1684 }
 0x863   : > { %v1763_v10 = vpop.permute.xlu1 %1762 }
 0x867   : > { %v1761_v12 = vpop.permute.xlu1 %1760 }
 0x869   : > { %v4370_v0 = vpop.eup %4369 }
 0x86a   : > { %v1512_v1 = vsel %vm823_vm3, %v4370_v0, 0.0 }
 0x871   : > { %1519 = vrot.lane.b32.xlu0 %v4949_v39, %s4651_s14  ;;  %s4663_s14 = smov 40  }
 0x890   : > { %1513 = vadd.xlane.f32.xlu0 %v1512_v1 }
 0x8a6   : > { %1682 = vrot.lane.b32.xlu0 %v4955_v41, %s4653_s17  ;;  %s4665_s17 = smov 100  }
 0x8e4   : > { %v1511_v2 = vpop.xlane.xlu0 %1510 }
 0x8e5   : > { %4371 = vrcp.f32 %v1511_v2 }
 0x8e8   : > { %v1520_v3 = vpop.permute.xlu0 %1519 }
 0x8e9   : > { %4083 = vmatpush3.msra.mxu0 %v1520_v3 }
 0x8ea   : > { %4092 = vmatprep.subr.mxu0 %v4642_v34 }
 0x8f2   : > { %v4372_v4 = vpop.eup %4371 }
 0x8f3   : > { %v1516_v5 = vmul.f32 %v4372_v4, %v4368_v59 }
 0x8f5   : > { %4085 = vmatmul.mubr.msk.f32.vlgmr.msra.gmra.mxu0 %vm823_vm3, %v1516_v5 }
 0x8f6   : > { %4093 = vmatpush3.xpose.msk.msra.mxu0 %vm669_vm2, %v1685_v6  ;;  %4094 = vmatprep.mubr.msk.f32.mxu0 %vm4643_vm1, %v4642_v34 }
 0x8f7   : > { %4102 = vmatprep.subr.mxu0 %v4642_v34 }
 0x919   : > { %v1514_v7 = vpop.xlane.xlu0 %1513 }
 0x91a   : > { %4373 = vrcp.f32 %v1514_v7 }
 0x91d   : > { %v1683_v8 = vpop.permute.xlu0 %1682 }
 0x91e   : > { %4095 = vmatmul.mubr.msk.f32.vlgmr.msra.gmra.mxu0 %vm669_vm2, %v1683_v8 }
 0x91f   : > { %4104 = vmatprep.mubr.msk.f32.mxu0 %vm4643_vm1, %v4642_v34 }
 0x927   : > { %v4374_v9 = vpop.eup %4373 }
 0x928   : > { %v1518_v11 = vmul.f32 %v4374_v9, %v4370_v0 }
 0x92a   : > { %4090 = vmatmul.mubr.msk.f32.vlgmr.msra.gmra.mxu1 %vm823_vm3, %v1518_v11 }
 0x92b   : > { %4098 = vmatpush3.xpose.msk.msra.mxu1 %vm669_vm2, %v1763_v10  ;;  %4099 = vmatprep.mubr.msk.f32.mxu1 %vm4643_vm1, %v4642_v34 }
 0x92c   : > { %4107 = vmatprep.subr.mxu1 %v4642_v34 }
 0x92e   : > { %4100 = vmatmul.mubr.msk.f32.vlgmr.msra.gmra.mxu1 %vm669_vm2, %v1761_v12 }
 0x92f   : > { %4109 = vmatprep.mubr.msk.f32.mxu1 %vm4643_vm1, %v4642_v34 }
 0x9b5   : > { %v5061_v13 = vpop.f32.mrf.mxu0 }
 0x9b7   : > { %v4086_v14 = vpop.f32.mrf.mxu0 }
 0x9de   : > { %v1756_v15 = vpop.f32.mrf.mxu0 }
 0x9df   : > { %v1838_v16 = vsel %vm823_vm3, %v1756_v15, -inf }
 0x9e0   : > { %1839 = vmax.xlane.f32.xlu0 %v1838_v16  ;;  %v4096_v17 = vpop.f32.mrf.mxu0 }
 0x9ea   : > { %v5064_v18 = vpop.f32.mrf.mxu1 }
 0x9ec   : > { %v4091_v19 = vpop.f32.mrf.mxu1 }
 0x9ee   : > { %v1834_v20 = vpop.f32.mrf.mxu1 }
 0x9ef   : > { %v1841_v21 = vsel %vm823_vm3, %v1834_v20, -inf }
 0x9f0   : > { %1842 = vmax.xlane.f32.xlu1 %v1841_v21  ;;  %v4101_v22 = vpop.f32.mrf.mxu1 }
 0xa01   : > { %1936 = vrot.lane.b32.xlu1 %v4947_v37, %s4654_s19 }
 0xa05   : > { %2025 = vrot.lane.b32.xlu1 %v4949_v39, %s4655_s24 }
 0xa09   : > { %2103 = vrot.lane.b32.xlu1 %v4947_v37, %s4655_s24  ;;  %s4667_s24 = smov 4  }
 0xa0d   : > { %2101 = vrot.lane.b32.xlu1 %v4964_v43, %s4656_s25 }
 0xa69   : > { %v1840_v23 = vpop.xlane.xlu0 %1839 }
 0xa6a   : > { %v1844_v24 = vsub.f32 %v1756_v15, %v1840_v23 }
 0xa6c   : > { %v1846_v25 = vmul.f32 1.442695, %v1844_v24 }
 0xa6e   : > { %4375 = vpow2.f32 %v1846_v25 }
 0xa79   : > { %v1843_v26 = vpop.xlane.xlu1 %1842 }
 0xa7a   : > { %v1845_v30 = vsub.f32 %v1834_v20, %v1843_v26 }
 0xa7b   : > { %v4376_v27 = vpop.eup %4375 }
 0xa7c   : > { %v1850_v28 = vsel %vm823_vm3, %v4376_v27, 0.0  ;;  %v1848_v31 = vmul.f32 1.442695, %v1845_v30 }
 0xa7d   : > { %1851 = vadd.xlane.f32.xlu0 %v1850_v28  ;;  %v1937_v29 = vpop.permute.xlu1 %1936 }
 0xa7e   : > { %4108 = vmatpush3.msra.mxu1 %v1937_v29  ;;  %4377 = vpow2.f32 %v1848_v31 }
 0xa7f   : > { %4117 = vmatprep.subr.mxu1 %v4642_v34 }
 0xa81   : > { %v2026_v42 = vpop.permute.xlu1 %2025 }
 0xa85   : > { %v2104_v48 = vpop.permute.xlu1 %2103 }
 0xa89   : > { %v2102_v51 = vpop.permute.xlu1 %2101 }
 0xa8b   : > { %v4378_v32 = vpop.eup %4377 }
 0xa8c   : > { %v1853_v33 = vsel %vm823_vm3, %v4378_v32, 0.0 }
 0xa93   : > { %1860 = vrot.lane.b32.xlu0 %v4949_v39, %s4654_s19  ;;  %s4666_s19 = smov 36  }
 0xab2   : > { %1854 = vadd.xlane.f32.xlu0 %v1853_v33 }
 0xac8   : > { %2023 = vrot.lane.b32.xlu0 %v4955_v41, %s4656_s25  ;;  %s4668_s25 = smov 8  }
 0xb06   : > { %v1852_v35 = vpop.xlane.xlu0 %1851 }
 0xb07   : > { %4379 = vrcp.f32 %v1852_v35 }
 0xb0a   : > { %v1861_v36 = vpop.permute.xlu0 %1860 }
 0xb0b   : > { %4103 = vmatpush3.msra.mxu0 %v1861_v36 }
 0xb0c   : > { %4112 = vmatprep.subr.mxu0 %v4642_v34 }
 0xb14   : > { %v4380_v38 = vpop.eup %4379 }
 0xb15   : > { %v1857_v40 = vmul.f32 %v4380_v38, %v4376_v27 }
 0xb17   : > { %4105 = vmatmul.mubr.msk.f32.vlgmr.msra.gmra.mxu0 %vm823_vm3, %v1857_v40 }
 0xb18   : > { %4113 = vmatpush3.xpose.msk.msra.mxu0 %vm669_vm2, %v2026_v42  ;;  %4114 = vmatprep.mubr.msk.f32.mxu0 %vm4643_vm1, %v4642_v34 }
 0xb19   : > { %4122 = vmatprep.subr.mxu0 %v4642_v34 }
 0xb3b   : > { %v1855_v44 = vpop.xlane.xlu0 %1854 }
 0xb3c   : > { %4381 = vrcp.f32 %v1855_v44 }
 0xb3f   : > { %v2024_v46 = vpop.permute.xlu0 %2023 }
 0xb40   : > { %4115 = vmatmul.mubr.msk.f32.vlgmr.msra.gmra.mxu0 %vm669_vm2, %v2024_v46 }
 0xb41   : > { %4124 = vmatprep.mubr.msk.f32.mxu0 %vm4643_vm1, %v4642_v34 }
 0xb49   : > { %v4382_v47 = vpop.eup %4381 }
 0xb4a   : > { %v1859_v49 = vmul.f32 %v4382_v47, %v4378_v32 }
 0xb4c   : > { %4110 = vmatmul.mubr.msk.f32.vlgmr.msra.gmra.mxu1 %vm823_vm3, %v1859_v49 }
 0xb4d   : > { %4118 = vmatpush3.xpose.msk.msra.mxu1 %vm669_vm2, %v2104_v48  ;;  %4119 = vmatprep.mubr.msk.f32.mxu1 %vm4643_vm1, %v4642_v34 }
 0xb4e   : > { %4127 = vmatprep.subr.mxu1 %v4642_v34 }
 0xb50   : > { %4120 = vmatmul.mubr.msk.f32.vlgmr.msra.gmra.mxu1 %vm669_vm2, %v2102_v51 }
 0xb51   : > { %4129 = vmatprep.mubr.msk.f32.mxu1 %vm4643_vm1, %v4642_v34 }
 0xbd7   : > { %v5093_v52 = vpop.f32.mrf.mxu0 }
 0xbd9   : > { %v4106_v53 = vpop.f32.mrf.mxu0 }
 0xc00   : > { %v2097_v54 = vpop.f32.mrf.mxu0 }
 0xc01   : > { %v2179_v55 = vsel %vm823_vm3, %v2097_v54, -inf }
 0xc02   : > { %2180 = vmax.xlane.f32.xlu0 %v2179_v55  ;;  %v4116_v56 = vpop.f32.mrf.mxu0 }
 0xc0c   : > { %v5096_v57 = vpop.f32.mrf.mxu1 }
 0xc0e   : > { %v4111_v58 = vpop.f32.mrf.mxu1 }
 0xc10   : > { %v2175_v59 = vpop.f32.mrf.mxu1 }
 0xc11   : > { %v2182_v60 = vsel %vm823_vm3, %v2175_v59, -inf }
 0xc12   : > { %2183 = vmax.xlane.f32.xlu1 %v2182_v60  ;;  %v4121_v61 = vpop.f32.mrf.mxu1 }
 0xc23   : > { %2277 = vrot.lane.b32.xlu1 %v4947_v37, %s4657_s22 }
 0xc27   : > { %2366 = vrot.lane.b32.xlu1 %v4949_v39, %s4658_s30 }
 0xc2b   : > { %2444 = vrot.lane.b32.xlu1 %v4947_v37, %s4658_s30  ;;  %s4670_s30 = smov 16  }
 0xc2f   : > { %2442 = vrot.lane.b32.xlu1 %v4964_v43, %s4659_s9 }
 0xc8b   : > { %v2181_v62 = vpop.xlane.xlu0 %2180 }
 0xc8c   : > { %v2185_v63 = vsub.f32 %v2097_v54, %v2181_v62 }
 0xc8e   : > { %v2187_v0 = vmul.f32 1.442695, %v2185_v63 }
 0xc90   : > { %4383 = vpow2.f32 %v2187_v0 }
 0xc9b   : > { %v2184_v1 = vpop.xlane.xlu1 %2183 }
 0xc9c   : > { %v2186_v5 = vsub.f32 %v2175_v59, %v2184_v1 }
 0xc9d   : > { %v4384_v2 = vpop.eup %4383 }
 0xc9e   : > { %v2191_v3 = vsel %vm823_vm3, %v4384_v2, 0.0  ;;  %v2189_v6 = vmul.f32 1.442695, %v2186_v5 }
 0xc9f   : > { %2192 = vadd.xlane.f32.xlu0 %v2191_v3  ;;  %v2278_v4 = vpop.permute.xlu1 %2277 }
 0xca0   : > { %4128 = vmatpush3.msra.mxu1 %v2278_v4  ;;  %4385 = vpow2.f32 %v2189_v6 }
 0xca1   : > { %4137 = vmatprep.subr.mxu1 %v4642_v34 }
 0xca3   : > { %v2367_v14 = vpop.permute.xlu1 %2366 }
 0xca7   : > { %v2445_v19 = vpop.permute.xlu1 %2444 }
 0xcab   : > { %v2443_v21 = vpop.permute.xlu1 %2442 }
 0xcad   : > { %v4386_v7 = vpop.eup %4385 }
 0xcae   : > { %v2194_v8 = vsel %vm823_vm3, %v4386_v7, 0.0 }
 0xcb5   : > { %2201 = vrot.lane.b32.xlu0 %v4949_v39, %s4657_s22  ;;  %s4669_s22 = smov 12  }
 0xcd4   : > { %2195 = vadd.xlane.f32.xlu0 %v2194_v8 }
 0xcea   : > { %2364 = vrot.lane.b32.xlu0 %v4955_v41, %s4659_s9  ;;  %s4671_s9 = smov 20  }
 0xd28   : > { %v2193_v9 = vpop.xlane.xlu0 %2192 }
 0xd29   : > { %4387 = vrcp.f32 %v2193_v9 }
 0xd2c   : > { %v2202_v10 = vpop.permute.xlu0 %2201 }
 0xd2d   : > { %4123 = vmatpush3.msra.mxu0 %v2202_v10 }
 0xd2e   : > { %4132 = vmatprep.subr.mxu0 %v4642_v34 }
 0xd36   : > { %v4388_v11 = vpop.eup %4387 }
 0xd37   : > { %v2198_v12 = vmul.f32 %v4388_v11, %v4384_v2 }
 0xd39   : > { %4125 = vmatmul.mubr.msk.f32.vlgmr.msra.gmra.mxu0 %vm823_vm3, %v2198_v12 }
 0xd3a   : > { %4133 = vmatpush3.xpose.msk.msra.mxu0 %vm669_vm2, %v2367_v14  ;;  %4134 = vmatprep.mubr.msk.f32.mxu0 %vm4643_vm1, %v4642_v34 }
 0xd3b   : > { %4142 = vmatprep.subr.mxu0 %v4642_v34 }
 0xd5d   : > { %v2196_v15 = vpop.xlane.xlu0 %2195 }
 0xd5e   : > { %4389 = vrcp.f32 %v2196_v15 }
 0xd61   : > { %v2365_v16 = vpop.permute.xlu0 %2364 }
 0xd62   : > { %4135 = vmatmul.mubr.msk.f32.vlgmr.msra.gmra.mxu0 %vm669_vm2, %v2365_v16 }
 0xd63   : > { %4144 = vmatprep.mubr.msk.f32.mxu0 %vm4643_vm1, %v4642_v34 }
 0xd6b   : > { %v4390_v17 = vpop.eup %4389 }
 0xd6c   : > { %v2200_v20 = vmul.f32 %v4390_v17, %v4386_v7 }
 0xd6e   : > { %4130 = vmatmul.mubr.msk.f32.vlgmr.msra.gmra.mxu1 %vm823_vm3, %v2200_v20 }
 0xd6f   : > { %4138 = vmatpush3.xpose.msk.msra.mxu1 %vm669_vm2, %v2445_v19  ;;  %4139 = vmatprep.mubr.msk.f32.mxu1 %vm4643_vm1, %v4642_v34 }
 0xd70   : > { %4147 = vmatprep.subr.mxu1 %v4642_v34 }
 0xd72   : > { %4140 = vmatmul.mubr.msk.f32.vlgmr.msra.gmra.mxu1 %vm669_vm2, %v2443_v21 }
 0xd73   : > { %4149 = vmatprep.mubr.msk.f32.mxu1 %vm4643_vm1, %v4642_v34 }
 0xdf9   : > { %v5125_v22 = vpop.f32.mrf.mxu0 }
 0xdfb   : > { %v4126_v23 = vpop.f32.mrf.mxu0 }
 0xe22   : > { %v2438_v24 = vpop.f32.mrf.mxu0 }
 0xe23   : > { %v2520_v25 = vsel %vm823_vm3, %v2438_v24, -inf }
 0xe24   : > { %2521 = vmax.xlane.f32.xlu0 %v2520_v25  ;;  %v4136_v26 = vpop.f32.mrf.mxu0 }
 0xe2e   : > { %v5128_v27 = vpop.f32.mrf.mxu1 }
 0xe30   : > { %v4131_v28 = vpop.f32.mrf.mxu1 }
 0xe32   : > { %v2516_v29 = vpop.f32.mrf.mxu1 }
 0xe33   : > { %v2523_v30 = vsel %vm823_vm3, %v2516_v29, -inf }
 0xe34   : > { %2524 = vmax.xlane.f32.xlu1 %v2523_v30  ;;  %v4141_v31 = vpop.f32.mrf.mxu1 }
 0xe45   : > { %2618 = vrot.lane.b32.xlu1 %v4947_v37, %s4660_s20 }
 0xe49   : > { %2707 = vrot.lane.b32.xlu1 %v4949_v39, %s4661_s23 }
 0xe4d   : > { %2785 = vrot.lane.b32.xlu1 %v4947_v37, %s4661_s23  ;;  %s4673_s23 = smov 28  }
 0xe51   : > { %2783 = vrot.lane.b32.xlu1 %v4964_v43, %s4662_s3 }
 0xead   : > { %v2522_v32 = vpop.xlane.xlu0 %2521 }
 0xeae   : > { %v2526_v33 = vsub.f32 %v2438_v24, %v2522_v32 }
 0xeb0   : > { %v2528_v35 = vmul.f32 1.442695, %v2526_v33 }
 0xeb2   : > { %4391 = vpow2.f32 %v2528_v35 }
 0xebd   : > { %v2525_v36 = vpop.xlane.xlu1 %2524 }
 0xebe   : > { %v2527_v44 = vsub.f32 %v2516_v29, %v2525_v36 }
 0xebf   : > { %v4392_v38 = vpop.eup %4391 }
 0xec0   : > { %v2532_v40 = vsel %vm823_vm3, %v4392_v38, 0.0  ;;  %v2530_v46 = vmul.f32 1.442695, %v2527_v44 }
 0xec1   : > { %2533 = vadd.xlane.f32.xlu0 %v2532_v40  ;;  %v2619_v42 = vpop.permute.xlu1 %2618 }
 0xec2   : > { %4148 = vmatpush3.msra.mxu1 %v2619_v42  ;;  %4393 = vpow2.f32 %v2530_v46 }
 0xec3   : > { %4157 = vmatprep.subr.mxu1 %v4642_v34 }
 0xec5   : > { %v2708_v55 = vpop.permute.xlu1 %2707 }
 0xec9   : > { %v2786_v60 = vpop.permute.xlu1 %2785 }
 0xecd   : > { %v2784_v62 = vpop.permute.xlu1 %2783 }
 0xecf   : > { %v4394_v47 = vpop.eup %4393 }
 0xed0   : > { %v2535_v48 = vsel %vm823_vm3, %v4394_v47, 0.0 }
 0xed7   : > { %2542 = vrot.lane.b32.xlu0 %v4949_v39, %s4660_s20  ;;  %s4672_s20 = smov 24  }
 0xef6   : > { %2536 = vadd.xlane.f32.xlu0 %v2535_v48 }
 0xf0c   : > { %2705 = vrot.lane.b32.xlu0 %v4955_v41, %s4662_s3  ;;  %s3932_s3 = sshll.u32 %s4767_s29, 8  ;;  %s4674_s29 = smov [#allocation12]  }
 0xf4a   : > { %v2534_v49 = vpop.xlane.xlu0 %2533 }
 0xf4b   : > { %4395 = vrcp.f32 %v2534_v49 }
 0xf4e   : > { %v2543_v51 = vpop.permute.xlu0 %2542 }
 0xf4f   : > { %4143 = vmatpush3.msra.mxu0 %v2543_v51 }
 0xf50   : > { %4152 = vmatprep.subr.mxu0 %v4642_v34 }
 0xf58   : > { %v4396_v53 = vpop.eup %4395 }
 0xf59   : > { %v2539_v54 = vmul.f32 %v4396_v53, %v4392_v38 }
 0xf5b   : > { %4145 = vmatmul.mubr.msk.f32.vlgmr.msra.gmra.mxu0 %vm823_vm3, %v2539_v54 }
 0xf5c   : > { %4153 = vmatpush3.xpose.msk.msra.mxu0 %vm669_vm2, %v2708_v55  ;;  %4154 = vmatprep.mubr.msk.f32.mxu0 %vm4643_vm1, %v4642_v34 }
 0xf5d   : > { %4162 = vmatprep.subr.mxu0 %v4642_v34 }
 0xf7f   : > { %v2537_v56 = vpop.xlane.xlu0 %2536 }
 0xf80   : > { %4397 = vrcp.f32 %v2537_v56 }
 0xf83   : > { %v2706_v58 = vpop.permute.xlu0 %2705 }
 0xf84   : > { %4155 = vmatmul.mubr.msk.f32.vlgmr.msra.gmra.mxu0 %vm669_vm2, %v2706_v58 }
 0xf85   : > { %4164 = vmatprep.mubr.msk.f32.mxu0 %vm4643_vm1, %v4642_v34 }
 0xf8d   : > { %v4398_v59 = vpop.eup %4397 }
 0xf8e   : > { %v2541_v61 = vmul.f32 %v4398_v59, %v4394_v47 }
 0xf90   : > { %4150 = vmatmul.mubr.msk.f32.vlgmr.msra.gmra.mxu1 %vm823_vm3, %v2541_v61 }
 0xf91   : > { %4158 = vmatpush3.xpose.msk.msra.mxu1 %vm669_vm2, %v2786_v60  ;;  %4159 = vmatprep.mubr.msk.f32.mxu1 %vm4643_vm1, %v4642_v34 }
 0xf92   : > { %4167 = vmatprep.subr.mxu1 %v4642_v34 }
 0xf94   : > { %4160 = vmatmul.mubr.msk.f32.vlgmr.msra.gmra.mxu1 %vm669_vm2, %v2784_v62 }
 0xf95   : > { %4169 = vmatprep.mubr.msk.f32.mxu1 %vm4643_vm1, %v4642_v34 }
0x101b   : > { %v5157_v63 = vpop.f32.mrf.mxu0 }
0x101d   : > { %v4146_v0 = vpop.f32.mrf.mxu0 }
0x1044   : > { %v2779_v1 = vpop.f32.mrf.mxu0 }
0x1045   : > { %v2861_v2 = vsel %vm823_vm3, %v2779_v1, -inf }
0x1046   : > { %2862 = vmax.xlane.f32.xlu0 %v2861_v2  ;;  %v4156_v3 = vpop.f32.mrf.mxu0 }
0x1050   : > { %v5160_v4 = vpop.f32.mrf.mxu1 }
0x1052   : > { %v4151_v5 = vpop.f32.mrf.mxu1 }
0x1054   : > { %v2857_v6 = vpop.f32.mrf.mxu1 }
0x1055   : > { %v2864_v7 = vsel %vm823_vm3, %v2857_v6, -inf }
0x1056   : > { %2865 = vmax.xlane.f32.xlu1 %v2864_v7  ;;  %v4161_v8 = vpop.f32.mrf.mxu1  ;;  %v3392_v7 = vld [vmem:[#allocation8 + $0x18] sm:$0xff] }
0x1057   : > { %v3391_v8 = vld [vmem:[#allocation8 + $0x10] sm:$0xff] }
0x1067   : > { %2959 = vrot.lane.b32.xlu1 %v4947_v37, %s4663_s14 }
0x106b   : > { %3048 = vrot.lane.b32.xlu1 %v4949_v39, %s4664_s16 }
0x106f   : > { %3126 = vrot.lane.b32.xlu1 %v4947_v37, %s4664_s16  ;;  %s5268_s16 = scalar_lea.hbm %s5326_s13, %s3932_s3 }
0x1073   : > { %3124 = vrot.lane.b32.xlu1 %v4964_v43, %s4665_s17 }
0x10cf   : > { %v2863_v9 = vpop.xlane.xlu0 %2862 }
0x10d0   : > { %v2867_v10 = vsub.f32 %v2779_v1, %v2863_v9 }
0x10d2   : > { %v2869_v11 = vmul.f32 1.442695, %v2867_v10  ;;  %v3390_v10 = vld [vmem:[#allocation8 + $0x8] sm:$0xff] }
0x10d4   : > { %4399 = vpow2.f32 %v2869_v11 }
0x10df   : > { %v2866_v12 = vpop.xlane.xlu1 %2865 }
0x10e0   : > { %v2868_v17 = vsub.f32 %v2857_v6, %v2866_v12  ;;  %v3389_v12 = vld [vmem:[#allocation8] sm:$0xff] }
0x10e1   : > { %v4400_v14 = vpop.eup %4399 }
0x10e2   : > { %v2873_v15 = vsel %vm823_vm3, %v4400_v14, 0.0  ;;  %v2871_v19 = vmul.f32 1.442695, %v2868_v17 }
0x10e3   : > { %2874 = vadd.xlane.f32.xlu0 %v2873_v15  ;;  %v2960_v16 = vpop.permute.xlu1 %2959 }
0x10e4   : > { %4168 = vmatpush3.msra.mxu1 %v2960_v16  ;;  %4401 = vpow2.f32 %v2871_v19 }
0x10e5   : > { %4177 = vmatprep.subr.mxu1 %v4642_v34 }
0x10e7   : > { %v3049_v26 = vpop.permute.xlu1 %3048 }
0x10eb   : > { %v3127_v30 = vpop.permute.xlu1 %3126 }
0x10ef   : > { %v3125_v32 = vpop.permute.xlu1 %3124 }
0x10f1   : > { %v4402_v20 = vpop.eup %4401 }
0x10f2   : > { %v2876_v43 = vsel %vm823_vm3, %v4402_v20, 0.0 }
0x10f9   : > { %2883 = vrot.lane.b32.xlu0 %v4949_v39, %s4663_s14 }
0x1118   : > { %2877 = vadd.xlane.f32.xlu0 %v2876_v43  ;;  %v3915_v43 = vld [vmem:[%s5319_s6] ss:$0 sm:$0xff] }
0x112e   : > { %3046 = vrot.lane.b32.xlu0 %v4955_v41, %s4665_s17 }
0x116c   : > { %v2875_v21 = vpop.xlane.xlu0 %2874 }
0x116d   : > { %4403 = vrcp.f32 %v2875_v21 }
0x1170   : > { %v2884_v23 = vpop.permute.xlu0 %2883 }
0x1171   : > { %4163 = vmatpush3.msra.mxu0 %v2884_v23 }
0x1172   : > { %4172 = vmatprep.subr.mxu0 %v4642_v34 }
0x117a   : > { %v4404_v24 = vpop.eup %4403 }
0x117b   : > { %v2880_v25 = vmul.f32 %v4404_v24, %v4400_v14 }
0x117d   : > { %4165 = vmatmul.mubr.msk.f32.vlgmr.msra.gmra.mxu0 %vm823_vm3, %v2880_v25  ;;  %v4427_v25 = vld [vmem:[%s4910_s5 + $0x8] sm:$0xff] }
0x117e   : > { %4173 = vmatpush3.xpose.msk.msra.mxu0 %vm669_vm2, %v3049_v26  ;;  %4174 = vmatprep.mubr.msk.f32.mxu0 %vm4643_vm1, %v4642_v34 }
0x117f   : > { %4182 = vmatprep.subr.mxu0 %v4642_v34 }
0x11a1   : > { %v2878_v28 = vpop.xlane.xlu0 %2877 }
0x11a2   : > { %4405 = vrcp.f32 %v2878_v28 }
0x11a5   : > { %v3047_v41 = vpop.permute.xlu0 %3046 }
0x11a6   : > { %4175 = vmatmul.mubr.msk.f32.vlgmr.msra.gmra.mxu0 %vm669_vm2, %v3047_v41 }
0x11a7   : > { %4184 = vmatprep.mubr.msk.f32.mxu0 %vm4643_vm1, %v4642_v34 }
0x11af   : > { %v4406_v29 = vpop.eup %4405 }
0x11b0   : > { %v2882_v31 = vmul.f32 %v4406_v29, %v4402_v20  ;;  %v4428_v29 = vld [vmem:[%s4910_s5] sm:$0xff] }
0x11b2   : > { %4170 = vmatmul.mubr.msk.f32.vlgmr.msra.gmra.mxu1 %vm823_vm3, %v2882_v31 }
0x11b3   : > { %4178 = vmatpush3.xpose.msk.msra.mxu1 %vm669_vm2, %v3127_v30  ;;  %4179 = vmatprep.mubr.msk.f32.mxu1 %vm4643_vm1, %v4642_v34 }
0x11b4   : > { %4187 = vmatprep.subr.mxu1 %v4642_v34 }
0x11b6   : > { %4180 = vmatmul.mubr.msk.f32.vlgmr.msra.gmra.mxu1 %vm669_vm2, %v3125_v32 }
0x11b7   : > { %4189 = vmatprep.mubr.msk.f32.mxu1 %vm4643_vm1, %v4642_v34 }
0x123d   : > { %v5189_v33 = vpop.f32.mrf.mxu0 }
0x123f   : > { %v4166_v35 = vpop.f32.mrf.mxu0 }
0x1266   : > { %v3120_v36 = vpop.f32.mrf.mxu0 }
0x1267   : > { %v3202_v38 = vsel %vm823_vm3, %v3120_v36, -inf }
0x1268   : > { %3203 = vmax.xlane.f32.xlu0 %v3202_v38  ;;  %v4176_v40 = vpop.f32.mrf.mxu0 }
0x1272   : > { %v3031_v42 = vpop.f32.mrf.mxu1 }
0x1274   : > { %v4171_v44 = vpop.f32.mrf.mxu1 }
0x1276   : > { %v3198_v46 = vpop.f32.mrf.mxu1 }
0x1277   : > { %v3205_v47 = vsel %vm823_vm3, %v3198_v46, -inf }
0x1278   : > { %3206 = vmax.xlane.f32.xlu1 %v3205_v47  ;;  %v4181_v48 = vpop.f32.mrf.mxu1 }
0x1279   : > { %v3527_v48 = vld [vmem:[#allocation9 + $0x18] sm:$0xff] }
0x1289   : > { %3300 = vrot.lane.b32.xlu1 %v4947_v37, %s4666_s19 }
0x128d   : > { %1332 = vrot.lane.b32.xlu1 %v5029_v45, %s4667_s24 }
0x1291   : > { %1334 = vrot.lane.b32.xlu1 %v5032_v50, %s4667_s24 }
0x1295   : > { %1675 = vrot.lane.b32.xlu1 %v5064_v18, %s4668_s25 }
0x1299   : > { %2016 = vrot.lane.b32.xlu1 %v5096_v57, %s4669_s22 }
0x129d   : > { %2357 = vrot.lane.b32.xlu1 %v5128_v27, %s4670_s30 }
0x12a1   : > { %2698 = vrot.lane.b32.xlu1 %v5160_v4, %s4671_s9 }
0x12a5   : > { %3039 = vrot.lane.b32.xlu1 %v3031_v42, %s4672_s20 }
0x12f1   : > { %v3204_v34 = vpop.xlane.xlu0 %3203 }
0x12f2   : > { %v3208_v37 = vsub.f32 %v3120_v36, %v3204_v34  ;;  %v3526_v34 = vld [vmem:[#allocation9 + $0x10] sm:$0xff] }
0x12f4   : > { %v3210_v45 = vmul.f32 1.442695, %v3208_v37  ;;  %v3525_v37 = vld [vmem:[#allocation9 + $0x8] sm:$0xff] }
0x12f6   : > { %4407 = vpow2.f32 %v3210_v45  ;;  %v3524_v45 = vld [vmem:[#allocation9] sm:$0xff] }
0x1301   : > { %v3207_v50 = vpop.xlane.xlu1 %3206 }
0x1302   : > { %v3209_v18 = vsub.f32 %v3198_v46, %v3207_v50 }
0x1303   : > { %v4408_v49 = vpop.eup %4407 }
0x1304   : > { %v3212_v51 = vmul.f32 1.442695, %v3209_v18  ;;  %v3214_v57 = vsel %vm823_vm3, %v4408_v49, 0.0 }
0x1305   : > { %3215 = vadd.xlane.f32.xlu0 %v3214_v57  ;;  %v3301_v53 = vpop.permute.xlu1 %3300 }
0x1306   : > { %4409 = vpow2.f32 %v3212_v51  ;;  %4188 = vmatpush3.msra.mxu1 %v3301_v53 }
0x1307   : > { %4203 = vmatprep.subr.mxu1 %v3527_v48 }
0x1309   : > { %v1333_v27 = vpop.permute.xlu1 %1332 }
0x130a   : > { %1339 = vst.msk [vmem:[#allocation2] sm:$0xff] %vm1338_vm4, %v1333_v27 }
0x130d   : > { %v1335_v54 = vpop.permute.xlu1 %1334 }
0x130e   : > { %1340 = vst.msk [vmem:[#allocation2 + $0x8] sm:$0xff] %vm1338_vm4, %v1335_v54  ;;  %v3918_v54 = vld [vmem:[%s5320_s7] ss:$0 sm:$0xff] }
0x1311   : > { %v1676_v55 = vpop.permute.xlu1 %1675 }
0x1312   : > { %1681 = vst.msk [vmem:[#allocation2 + $0x8] sm:$0xff] %vm1679_vm5, %v1676_v55 }
0x1313   : > { %v4410_v56 = vpop.eup %4409 }
0x1314   : > { %v3217_v58 = vsel %vm823_vm3, %v4410_v56, 0.0 }
0x1315   : > { %3218 = vadd.xlane.f32.xlu0 %v3217_v58  ;;  %v2017_v59 = vpop.permute.xlu1 %2016 }
0x1316   : > { %2022 = vst.msk [vmem:[#allocation2 + $0x8] sm:$0xff] %vm2020_vm6, %v2017_v59 }
0x1319   : > { %v2358_v60 = vpop.permute.xlu1 %2357 }
0x131a   : > { %2363 = vst.msk [vmem:[#allocation2 + $0x8] sm:$0xff] %vm2361_vm7, %v2358_v60 }
0x131d   : > { %v2699_v61 = vpop.permute.xlu1 %2698 }
0x131e   : > { %2704 = vst.msk [vmem:[#allocation2 + $0x8] sm:$0xff] %vm2702_vm8, %v2699_v61 }
0x1321   : > { %v3040_v62 = vpop.permute.xlu1 %3039 }
0x1322   : > { %3045 = vst.msk [vmem:[#allocation2 + $0x8] sm:$0xff] %vm3043_vm9, %v3040_v62 }
0x132b   : > { %3224 = vrot.lane.b32.xlu0 %v4949_v39, %s4666_s19  ;;  %s4565_s19 = sshll.u32 %s4674_s29, 4  ;;  %s4566_s19 = int_to_ptr.vmem [resolvable:$false] %s4565_s19 }
0x132c   : > { %s4567_s24 = scalar_lea.vmem %s4566_s19, 512 }
0x132f   : > { %1673 = vrot.lane.b32.xlu0 %v5061_v13, %s4668_s25 }
0x1333   : > { %2014 = vrot.lane.b32.xlu0 %v5093_v52, %s4669_s22 }
0x1337   : > { %2355 = vrot.lane.b32.xlu0 %v5125_v22, %s4670_s30 }
0x133b   : > { %2696 = vrot.lane.b32.xlu0 %v5157_v63, %s4671_s9 }
0x133f   : > { %3037 = vrot.lane.b32.xlu0 %v5189_v33, %s4672_s20  ;;  %s516_s20 = scalar_lea.vmem [#allocation12], %s3856_s21  ;;  %s3721_s21 = scalar_lea.sflag [#allocation5], %s4904_s11 }
0x138e   : > { %v3216_v0 = vpop.xlane.xlu0 %3215 }
0x138f   : > { %4411 = vrcp.f32 %v3216_v0 }
0x139c   : > { %v4412_v2 = vpop.eup %4411 }
0x139d   : > { %v3221_v3 = vmul.f32 %v4412_v2, %v4408_v49  ;;  %v3629_v2 = vld [vmem:[#allocation11 + $0x10] sm:$0xff] }
0x139e   : > { %v3219_v1 = vpop.xlane.xlu0 %3218 }
0x139f   : > { %4413 = vrcp.f32 %v3219_v1  ;;  %v3630_v1 = vld [vmem:[#allocation11 + $0x18] sm:$0xff] }
0x13a2   : > { %v3225_v39 = vpop.permute.xlu0 %3224 }
0x13a3   : > { %4183 = vmatpush3.msra.mxu0 %v3225_v39  ;;  %v3628_v39 = vld [vmem:[#allocation11 + $0x8] sm:$0xff] }
0x13a4   : > { %4185 = vmatmul.mubr.msk.f32.vlgmr.msra.gmra.mxu0 %vm823_vm3, %v3221_v3  ;;  %4192 = vmatprep.subr.mxu0 %v3392_v7  ;;  %v3627_v3 = vld [vmem:[#allocation11] sm:$0xff] }
0x13a5   : > { %4193 = vmatpush3.msra.mxu0 %v3392_v7 }
0x13a6   : > { %v1674_v13 = vpop.permute.xlu0 %1673  ;;  %4194 = vmatprep.subr.mxu0 %v3391_v8 }
0x13a7   : > { %1680 = vst.msk [vmem:[#allocation2] sm:$0xff] %vm1679_vm5, %v1674_v13  ;;  %4195 = vmatpush3.msra.mxu0 %v3391_v8  ;;  %v3920_v13 = vld [vmem:[%s5323_s10] ss:$0 sm:$0xff] }
0x13a8   : > { %4196 = vmatprep.subr.mxu0 %v3390_v10 }
0x13a9   : > { %4197 = vmatpush3.msra.mxu0 %v3390_v10 }
0x13aa   : > { %v2015_v52 = vpop.permute.xlu0 %2014  ;;  %4198 = vmatprep.subr.mxu0 %v3389_v12 }
0x13ab   : > { %2021 = vst.msk [vmem:[#allocation2] sm:$0xff] %vm2020_vm6, %v2015_v52  ;;  %4199 = vmatpush3.msra.mxu0 %v3389_v12 }
0x13ac   : > { %v4414_v22 = vpop.eup %4413  ;;  %4214 = vmatprep.subr.mxu0 %v3630_v1 }
0x13ad   : > { %v3223_v63 = vmul.f32 %v4414_v22, %v4410_v56  ;;  %v3919_v56 = vld [vmem:[%s5321_s8] ss:$0 sm:$0xff] }
0x13ae   : > { %v2356_v4 = vpop.permute.xlu0 %2355 }
0x13af   : > { %2362 = vst.msk [vmem:[#allocation2] sm:$0xff] %vm2361_vm7, %v2356_v4  ;;  %4190 = vmatmul.mubr.msk.f32.vlgmr.msra.gmra.mxu1 %vm823_vm3, %v3223_v63 }
0x13b0   : > { %4204 = vmatpush3.msra.mxu1 %v3527_v48 }
0x13b1   : > { %4205 = vmatprep.subr.mxu1 %v3526_v34 }
0x13b2   : > { %v2697_v5 = vpop.permute.xlu0 %2696  ;;  %4206 = vmatpush3.msra.mxu1 %v3526_v34 }
0x13b3   : > { %2703 = vst.msk [vmem:[#allocation2] sm:$0xff] %vm2702_vm8, %v2697_v5  ;;  %4207 = vmatprep.subr.mxu1 %v3525_v37 }
0x13b4   : > { %4208 = vmatpush3.msra.mxu1 %v3525_v37 }
0x13b5   : > { %4209 = vmatprep.subr.mxu1 %v3524_v45 }
0x13b6   : > { %v3038_v6 = vpop.permute.xlu0 %3037  ;;  %4210 = vmatpush3.msra.mxu1 %v3524_v45 }
0x13b7   : > { %3044 = vst.msk [vmem:[#allocation2] sm:$0xff] %vm3043_vm9, %v3038_v6 }
0x1464   : > { %v3296_v9 = vpop.f32.mrf.mxu0 }
0x1465   : > { %3378 = vrot.lane.b32.xlu0 %v3296_v9, %s4673_s23 }
0x1466   : > { %v4186_v11 = vpop.f32.mrf.mxu0 }
0x146f   : > { %v3372_v14 = vpop.f32.mrf.mxu1 }
0x1470   : > { %3380 = vrot.lane.b32.xlu1 %v3372_v14, %s4673_s23  ;;  %s3734_s23 = sshll.u32 %s516_s20, 4  ;;  %s5262_s23 = int_to_ptr.vmem [resolvable:$true] %s3734_s23 }
0x1471   : > { %v4191_v15 = vpop.f32.mrf.mxu1  ;;  %s4561_s17 = scalar_lea.vmem %s5262_s23, 256  ;;  %p4568_p13 = scmp.lt.s32.totalorder %s5262_s23, %s4566_s19 }
0x1472   : > { %p4562_p10 = scmp.ne.s32.totalorder %s5262_s23, %s4561_s17  ;;  %p4569_p0 = scmp.lt.s32.totalorder %s4567_s24, %s4561_s17 }
0x1474   : > { %p4563_p7 = pnand %p4562_p10, %p5360_p12  ;;  %p4570_p11 = por %p4569_p0, %p4568_p13 }
0x1476   : > { %p4564_p1 = pneg %p4563_p7 }
0x1478   : > { %p4571_p5 = pnand %p4570_p11, %p4564_p1 }
0x14d7   : > { %v3379_v16 = vpop.permute.xlu0 %3378 }
0x14d8   : > { %3385 = vst.msk [vmem:[#allocation2] sm:$0xff] %vm3384_vm10, %v3379_v16 }
0x14df   : > { %v3387_v17 = vld [vmem:[#allocation2] sm:$0xff] }
0x14e0   : > { %4200 = vmatprep.mubr.msk.f32.mxu0 %vm529_vm0, %v3387_v17 }
0x14e2   : > { %v3381_v19 = vpop.permute.xlu1 %3380 }
0x14e3   : > { %3386 = vst.msk [vmem:[#allocation2 + $0x8] sm:$0xff] %vm3384_vm10, %v3381_v19  ;;  %v3923_v19 = vld [vmem:[%s5325_s12] ss:$0 sm:$0xff] }
0x14ea   : > { %v3388_v20 = vld [vmem:[#allocation2 + $0x8] sm:$0xff] }
0x14eb   : > { %4201 = vmatmul.mubr.msk.f32.vlgmr.msra.gmra.mxu0 %vm529_vm0, %v3388_v20 }
0x14ec   : > { %4215 = vmatpush3.msra.mxu0 %v3630_v1 }
0x14ed   : > { %4216 = vmatprep.subr.mxu0 %v3629_v2 }
0x14ee   : > { %4217 = vmatpush3.msra.mxu0 %v3629_v2 }
0x14ef   : > { %4218 = vmatprep.subr.mxu0 %v3628_v39 }
0x14f0   : > { %4219 = vmatpush3.msra.mxu0 %v3628_v39 }
0x14f1   : > { %4220 = vmatprep.subr.mxu0 %v3627_v3 }
0x14f2   : > { %4221 = vmatpush3.msra.mxu0 %v3627_v3 }
0x15ab   : > { %v4202_v21 = vpop.f32.mrf.mxu0 }
0x15ac   : > { %v3477_v23 = vadd.f32 %v4202_v21, %v3915_v43 }
0x15ad   : > { %v3471_v24 = vpop.f32.mrf.mxu0 }
0x15ae   : > { %v3481_v26 = vadd.f32 %v4427_v25, %v3477_v23  ;;  %v3472_v28 = vadd.f32 %v3915_v43, %v3471_v24 }
0x15b0   : > { %v3485_v41 = vsel %vm529_vm0, %v3481_v26, 0.0  ;;  %v3480_v30 = vadd.f32 %v4428_v29, %v3472_v28 }
0x15b1   : > { %3486 = vadd.xlane.f32.xlu1 %v3485_v41 }
0x15b2   : > { %v3482_v31 = vsel %vm529_vm0, %v3480_v30, 0.0 }
0x15b3   : > { %3483 = vadd.xlane.f32.xlu0 %v3482_v31 }
0x163a   : > { %v3487_v32 = vpop.xlane.xlu1 %3486 }
0x163b   : > { %v3489_v33 = vmul.f32 0.03125, %v3487_v32 }
0x163c   : > { %v3484_v35 = vpop.xlane.xlu0 %3483 }
0x163d   : > { %v3488_v36 = vmul.f32 0.03125, %v3484_v35  ;;  %v3491_v38 = vsub.f32 %v3481_v26, %v3489_v33 }
0x163f   : > { %v3490_v40 = vsub.f32 %v3480_v30, %v3488_v36  ;;  %v3493_v46 = vmul.f32 %v3491_v38, %v3491_v38 }
0x1641   : > { %v3492_v42 = vmul.f32 %v3490_v40, %v3490_v40  ;;  %v3497_v47 = vsel %vm529_vm0, %v3493_v46, 0.0 }
0x1643   : > { %v3494_v44 = vsel %vm529_vm0, %v3492_v42, 0.0 }
0x1644   : > { %3495 = vadd.xlane.f32.xlu0 %v3494_v44 }
0x1648   : > { %3498 = vadd.xlane.f32.xlu0 %v3497_v47 }
0x16cd   : > { %v3496_v50 = vpop.xlane.xlu0 %3495 }
0x16ce   : > { %v3500_v18 = vmul.f32 0.03125, %v3496_v50 }
0x16d0   : > { %v3502_v49 = vadd.f32 1e-05, %v3500_v18 }
0x16d1   : > { %v3499_v51 = vpop.xlane.xlu0 %3498 }
0x16d2   : > { %4415 = vrsqrt.f32 %v3502_v49  ;;  %v3501_v57 = vmul.f32 0.03125, %v3499_v51 }
0x16d4   : > { %v3503_v53 = vadd.f32 1e-05, %v3501_v57 }
0x16d6   : > { %4417 = vrsqrt.f32 %v3503_v53 }
0x16df   : > { %v4416_v27 = vpop.eup %4415 }
0x16e0   : > { %v3506_v55 = vmul.f32 %v4416_v27, %v3490_v40 }
0x16e2   : > { %v3514_v58 = vmul.f32 %v3918_v54, %v3506_v55 }
0x16e3   : > { %v4418_v59 = vpop.eup %4417 }
0x16e4   : > { %v3507_v60 = vmul.f32 %v4418_v59, %v3491_v38  ;;  %v3522_v61 = vadd.f32 %v3919_v56, %v3514_v58 }
0x16e6   : > { %v3515_v62 = vmul.f32 %v3918_v54, %v3507_v60  ;;  %4211 = vmatprep.mubr.msk.f32.mxu1 %vm529_vm0, %v3522_v61 }
0x16e8   : > { %v3523_v0 = vadd.f32 %v3919_v56, %v3515_v62 }
0x16ea   : > { %4212 = vmatmul.mubr.msk.f32.vlgmr.msra.gmra.mxu1 %vm529_vm0, %v3523_v0 }
0x17aa   : > { %v4213_v52 = vpop.f32.mrf.mxu1 }
0x17ab   : > { %v3612_v22 = vadd.f32 %v4213_v52, %v3920_v13 }
0x17ac   : > { %v3606_v63 = vpop.f32.mrf.mxu1 }
0x17ad   : > { %v3616_v4 = vsub.f32 0.0, %v3612_v22  ;;  %v3607_v5 = vadd.f32 %v3920_v13, %v3606_v63 }
0x17af   : > { %v3619_v6 = vmul.f32 1.442695, %v3616_v4  ;;  %v3615_v7 = vsub.f32 0.0, %v3607_v5 }
0x17b1   : > { %4419 = vpow2.f32 %v3619_v6  ;;  %v3617_v8 = vmul.f32 1.442695, %v3615_v7 }
0x17b3   : > { %4421 = vpow2.f32 %v3617_v8 }
0x17be   : > { %v4420_v9 = vpop.eup %4419 }
0x17bf   : > { %v3622_v10 = vadd.f32 1.0, %v4420_v9 }
0x17c0   : > { %v4422_v11 = vpop.eup %4421 }
0x17c1   : > { %v3621_v12 = vadd.f32 1.0, %v4422_v11  ;;  %4423 = vrcp.f32 %v3622_v10 }
0x17c3   : > { %4425 = vrcp.f32 %v3621_v12 }
0x17ce   : > { %v4424_v14 = vpop.eup %4423 }
0x17cf   : > { %v3626_v17 = vmul.f32 %v4424_v14, %v3612_v22 }
0x17d0   : > { %v4426_v15 = vpop.eup %4425 }
0x17d1   : > { %v3624_v16 = vmul.f32 %v4426_v15, %v3607_v5 }
0x17d3   : > { %4222 = vmatprep.mubr.msk.f32.mxu0 %vm529_vm0, %v3624_v16 }
0x17d4   : > { %4223 = vmatmul.mubr.msk.f32.vlgmr.msra.gmra.mxu0 %vm529_vm0, %v3626_v17 }
0x1894   : > { %v4224_v20 = vpop.f32.mrf.mxu0 }
0x1895   : > { %v3715_v43 = vadd.f32 %v4224_v20, %v3923_v19 }
0x1896   : > { %v3709_v21 = vpop.f32.mrf.mxu0 }
0x1897   : > { %3719 = vst.msk [vmem:[%s516_s20 + $0x8] sm:$0xff] %vm529_vm0, %v3715_v43  ;;  %v3710_v23 = vadd.f32 %v3923_v19, %v3709_v21 }
0x1899   : > { %3718 = vst.msk [vmem:[%s516_s20] sm:$0xff] %vm529_vm0, %v3710_v23 }
0x189a   : > { %4574 = shalt.err (!%p4571_p5)
}
0x189b   : > { %s4575_s22 = scalar_lea.hbm %s5268_s16, 256  ;;  %s4579_s20 = scalar_lea.hbm %s5326_s13, 512 }
0x189c   : > { %p4576_p6 = scmp.ne.s32.totalorder %s5268_s16, %s4575_s22  ;;  %p4580_p9 = scmp.lt.s32.totalorder %s5268_s16, %s5326_s13 }
0x189d   : > { %p4581_p2 = scmp.lt.s32.totalorder %s4579_s20, %s4575_s22 }
0x189e   : > { %p4577_p4 = pnand %p4576_p6, %p5360_p12 }
0x189f   : > { %p4582_p3 = por %p4581_p2, %p4580_p9 }
0x18a0   : > { %p4578_p8 = pneg %p4577_p4 }
0x18a2   : > { %p4583_p10 = pnand %p4582_p3, %p4578_p8 }
0x18a4   : > { %4586 = shalt.err (!%p4583_p10)
}
0x18a5   : > { %s4675_s5 = smov 128  }
0x18a6   : > { %4243 = dma.vmem_to_hbm [thread:$0]  (%p5360_p12), %s5262_s23, 256, %s5268_s16, %s3721_s21, %s4675_s5, %s4675_s5, %s4668_s25  }
0x18a7 PF: > { %s5361_s17 = sld [smem:[#allocation17_spill]]  ;;  %p5364_p1 = scmp.ge.s32.totalorder %s4633_s28, 2 }
0x18a8   : > { %s5362_s29 = sld [smem:[#allocation18_spill]] }
0x18ad   : > { %s3749_s19 = sand.u32 1, %s5361_s17  }
0x18ae   : > { %p5363_p7 = scmp.ne.s32.totalorder %s5362_s29, 0  ;;  %s3750_s24 = scalar_lea.sflag [#allocation5], %s3749_s19 }
0x18b0   : > { %p4263_p13 = pnand %p5364_p1, %p5363_p7 }
0x18b2   : > { %p4264_p0 = pneg %p4263_p13 }
0x18b4   : > { %4616 = dma.done.wait (%p4264_p0), %s3750_s24, 256  }
0x18b5   : > { %4618 = vsyncadd (%p4264_p0), %s3750_s24, 4294967040  ;;  %s5365_s15 = sld [smem:[#allocation19_spill]]  ;;  %p28_p11 = scmp.ge.s32.totalorder %s4846_s18, 4  }
0x18b6   : > { %s5366_s25 = smov %s4625_s26  ;;  %s5367_s26 = smov %s4629_s27 }
0x18b7   : > { %s5369_s28 = smov %s4846_s18  ;;  %30 = sbr.rel (!%p28_p11) target bundleno = 12 (0xc), region = 133 }
0x18bb   : > { %s5368_s27 = smov %s5365_s15 }
0x18bc   :  { %3755 = vsyncpa [#allocation4], 1 }
0x18bd   :  { %3757 = vsyncpa [#allocation4 + $0x1], 1 }
0x18be   :  { %3758 = vsyncpa [#allocation7], 1 }
0x18bf   :  { %3759 = vsyncpa [#allocation10], 1 }
0x18c0   :  { %3760 = vsyncpa [#allocation5], 1 }
0x18c1   :  { %3762 = vsyncpa [#allocation5 + $0x1], 1 }

</bundles_post_ra>
